<compile_context>
chip_gen: v7x
topology: tpu7x:2x2x1
jax: 0.10.0
libtpu: 0.0.40
codegen_flags: <defaults>
</compile_context>

<pallas_src>
import math

import jax
import jax.numpy as jnp
from jax.experimental import pallas as pl
from jax.experimental.pallas import tpu as pltpu


# --------------------------------------------------------------------------- #
# Kernel
# --------------------------------------------------------------------------- #
def cider_kernel(ml_ref, hist_ref, cand_ref, wr_ref, wqk_ref, vqk_ref,
                 out_ref, gcn_ref):
    """One batch-block of the CIDER forward.

    ml_ref   : [H, Dp]      f32  lin_l(mean over FULL batch) + bias (hoisted)
    hist_ref : [bb*H, Dp]   act  history embeddings of this batch block (flat)
    cand_ref : [bb*N, Dp]   act  candidate news representations (flat)
    wr_ref   : [Dp, Dp]     act  SAGEConv lin_r (no bias)
    wqk_ref  : [Dp, Dp]     act  (Wq / sqrt(A)) @ Wk^T  (K projection folded in)
    vqk_ref  : [1, Dp]      f32  (bq / sqrt(A)) @ Wk^T
    out_ref  : [bb*N, Dp]   act  user representation for this batch block
    gcn_ref  : [bb*H, Dp]   act  VMEM scratch holding gcn in the MXU dtype
    """
    H, Dp = ml_ref.shape
    bb = hist_ref.shape[0] // H          # batch rows in this block
    N = cand_ref.shape[0] // bb

    # ---- SAGEConv lin_r over the whole block: ONE bf16 MXU matmul, f32 acc.
    xr = jnp.dot(hist_ref[...], wr_ref[...],
                 preferred_element_type=jnp.float32)               # [bb*H, Dp]

    # ---- Bipartite-graph quirk of the reference model: only nodes with
    # GLOBAL batch index < max_history_num receive the aggregated message
    # lin_l(mean over the FULL batch).  Gate the add so blocks that do not
    # intersect [0, H) skip the iota / mask / broadcast-add entirely.
    gb_start = pl.program_id(0) * bb

    @pl.when(gb_start < H)
    def _():
        gb = gb_start + jax.lax.broadcasted_iota(jnp.int32, (bb, 1, 1), 0)
        mask = (gb < H).astype(jnp.float32)                        # [bb, 1, 1]
        gcn = xr.reshape(bb, H, Dp) + mask * ml_ref[...][None, :, :]
        gcn_ref[...] = gcn.reshape(bb * H, Dp).astype(gcn_ref.dtype)

    @pl.when(gb_start >= H)
    def _():
        gcn_ref[...] = xr.astype(gcn_ref.dtype)

    # ---- Q projection with the K projection folded in (one bf16 matmul).
    q = jnp.dot(cand_ref[...], wqk_ref[...],
                preferred_element_type=jnp.float32) + vqk_ref[...]  # [bb*N, Dp] f32
    q3 = q.reshape(bb, N, Dp)

    use_mxu_attn = (H >= 64) and (N >= 64)
    if use_mxu_attn:
        # Batched MXU path: only worth it once the per-batch matmuls are big
        # enough to feed the 256x256 MXU.  Operands kept in bf16, f32 acc.
        gcn3 = gcn_ref[...].reshape(bb, H, Dp)
        a = jnp.einsum('bnd,bhd->bnh', q3.astype(gcn3.dtype), gcn3,
                       preferred_element_type=jnp.float32)          # [bb, N, H]
        a = a - jnp.max(a, axis=-1, keepdims=True)
        p = jnp.exp(a)
        alpha = p * pl.reciprocal(jnp.sum(p, axis=-1, keepdims=True), approx=True)
        out = jnp.einsum('bnh,bhd->bnd', alpha.astype(gcn3.dtype), gcn3,
                         preferred_element_type=jnp.float32)        # [bb, N, Dp]
    else:
        # Small H/N: each per-batch matmul is a ~(N x Dp)x(Dp x H) sliver with
        # <1% MXU utilization, so do the dot-products on the VPU/XLU instead
        # (broadcast-multiply + reduce) as filler work in otherwise-idle slots.
        gcn3 = gcn_ref[...].reshape(bb, H, Dp).astype(jnp.float32)
        a = jnp.sum(q3[:, :, None, :] * gcn3[:, None, :, :], axis=-1)  # [bb,N,H]
        a = a - jnp.max(a, axis=-1, keepdims=True)
        p = jnp.exp(a)
        alpha = p * pl.reciprocal(jnp.sum(p, axis=-1, keepdims=True), approx=True)
        out = jnp.sum(alpha[:, :, :, None] * gcn3[:, None, :, :], axis=2)  # [bb,N,Dp]

    out_ref[...] = out.reshape(bb * N, Dp).astype(out_ref.dtype)   # lane-dense store


# --------------------------------------------------------------------------- #
# Wrapper helpers
# --------------------------------------------------------------------------- #
def _round_up(x, m):
    return ((x + m - 1) // m) * m


def _pad2d(x, rows, cols):
    r, c = x.shape
    return jnp.pad(x, ((0, rows - r), (0, cols - c)))


def _vmem_config():
    """Per-generation VMEM limit + TensorCore-count hint.

    v5e/v6e: 128 MiB physical VMEM, 1 TC  -> raise the scoped limit to 64 MiB.
    v7x    :  64 MiB physical VMEM, 2 TCs -> cap at 44 MiB, prefer even grid
              step counts (balanced 'parallel' sharding across the cores).
    """
    cap = 128 * 1024 * 1024
    try:
        cap = int(pltpu.get_tpu_info().vmem_capacity_bytes)
    except Exception:
        pass
    if cap <= 64 * 1024 * 1024:
        return 44 * 1024 * 1024, True      # v7x-class part
    return 64 * 1024 * 1024, False         # v5e / v6e-class part


def _block_vmem_bytes(bb, H, N, Dp, act_itemsize, use_mxu_attn):
    """Approximate VMEM footprint of one grid step.

    All BlockSpec operands are counted x2 (the pipeline double-buffers even
    the constant-index weight / ml blocks).  f32 temporaries are NOT
    flat-summed: only the peak set of concurrently-live slabs is counted,
    since the compiler reuses their storage."""
    dbl = 2
    streamed = dbl * (bb * H * Dp + 2 * bb * N * Dp) * act_itemsize   # hist, cand, out
    resident = dbl * (2 * Dp * Dp * act_itemsize + (H * Dp + Dp) * 4)  # wr, wqk, ml, vqk
    gcn_scratch = bb * H * Dp * act_itemsize
    attn = bb * N * (H * Dp if not use_mxu_attn else max(H, Dp)) * 4
    temps = (2 * bb * H * Dp + 2 * bb * N * Dp) * 4 + attn
    return streamed + resident + gcn_scratch + temps


def _pick_block_b(B, H, N, Dp, act_itemsize, budget, multi_tc, use_mxu_attn):
    """Largest batch block bb dividing B that (a) keeps the streamed hist/cand
    row blocks sublane-aligned (16 rows for bf16 -- two rows per packed
    sublane -- else 8), (b) fits the VMEM budget.  On 2-TC parts prefer an
    even number of grid steps; on 1-TC parts prefer the fewest steps."""
    align = 16 if act_itemsize < 4 else 8
    divisors = [bb for bb in range(B, 0, -1) if B % bb == 0]

    def ok(bb, a):
        return bb == B or ((bb * H) % a == 0 and (bb * N) % a == 0)

    cands = [bb for bb in divisors if ok(bb, align)]
    if not cands:
        cands = [bb for bb in divisors if ok(bb, 8)] or divisors
    fitting = [bb for bb in cands
               if _block_vmem_bytes(bb, H, N, Dp, act_itemsize, use_mxu_attn) <= budget]
    pool = fitting if fitting else cands[-1:]
    if multi_tc:
        even = [bb for bb in pool if (B // bb) >= 2 and (B // bb) % 2 == 0]
        if even:
            return even[0]
        multi = [bb for bb in pool if (B // bb) >= 2]
        if multi:
            return multi[0]
    return pool[0]


def prepare_cider_params(params, attention_dim):
    """One-time param prep:
      * zero-pad feature dims to 128-lane widths (lane-dense loads/stores),
      * fold the K projection away:  Q @ K^T = cand (Wq Wk^T) gcn^T + bq Wk^T gcn^T
        so precompute  wqk = (Wq/sqrt(A)) @ Wk^T  [D,D]  and
        vqk = (bq/sqrt(A)) @ Wk^T  [1,D]  (also folds the attention scale),
      * keep MXU weights in bf16 (single-pass MXU) and biases in f32."""
    D = params['wr'].shape[0]
    A = params['wk'].shape[1]
    Dp = _round_up(D, 128)
    scale = 1.0 / math.sqrt(float(attention_dim))
    wq32 = params['wq'].astype(jnp.float32) * scale
    wk32 = params['wk'].astype(jnp.float32)
    bq32 = params['bq'].astype(jnp.float32) * scale
    wqk = wq32 @ wk32.T                                   # [D, D]
    vqk = bq32 @ wk32.T                                   # [1, D]
    mxu_dt = params['wq'].dtype
    return dict(
        # lin_l of the hoisted global-mean branch stays unpadded f32 (wrapper-side).
        wl=params['wl'].astype(jnp.float32),
        bl=params['bl'].astype(jnp.float32),
        wr=_pad2d(params['wr'], Dp, Dp).astype(mxu_dt),
        wqk=_pad2d(wqk, Dp, Dp).astype(mxu_dt),
        vqk=_pad2d(vqk, 1, Dp),                           # f32
        D=D, A=A, Dp=Dp,
    )


# --------------------------------------------------------------------------- #
# Forward
# --------------------------------------------------------------------------- #
def cider_forward(history_embedding, candidate_news_representation, prep):
    """CIDER.forward after the news_encoder: GraphSAGE over the bipartite
    user/history graph + scaled-dot attention of candidates over history.
    Returns the user representation [B, N, D] in the activation dtype."""
    B, H, D = history_embedding.shape
    N = candidate_news_representation.shape[1]
    Dp = prep['Dp']
    assert D == prep['D']
    act_dt = history_embedding.dtype
    act_itemsize = jnp.dtype(act_dt).itemsize

    # ---- hoisted cross-batch branch of SAGEConv: lin_l(mean over FULL batch).
    # Tiny ([H, D]) and global over B, so it is computed in plain XLA and
    # passed in; this removes the only cross-batch dependency and lets the
    # kernel tile over the batch dimension.
    mean_x = jnp.mean(history_embedding.astype(jnp.float32), axis=0)      # [H, D]
    ml = _pad2d(mean_x @ prep['wl'] + prep['bl'][0], H, Dp)               # [H, Dp] f32

    # ---- lane-pad activations and flatten so every projection is one 2-D matmul.
    pad_d = Dp - D
    hist2 = jnp.pad(history_embedding,
                    ((0, 0), (0, 0), (0, pad_d))).reshape(B * H, Dp)
    cand2 = jnp.pad(candidate_news_representation,
                    ((0, 0), (0, 0), (0, pad_d))).reshape(B * N, Dp)

    vmem_limit, multi_tc = _vmem_config()
    budget = int(0.75 * vmem_limit)
    use_mxu_attn = (H >= 64) and (N >= 64)
    bb = _pick_block_b(B, H, N, Dp, act_itemsize, budget, multi_tc, use_mxu_attn)
    grid = (B // bb,)

    out2 = pl.pallas_call(
        cider_kernel,
        out_shape=jax.ShapeDtypeStruct((B * N, Dp), act_dt),
        grid_spec=pltpu.PrefetchScalarGridSpec(
            num_scalar_prefetch=0,
            grid=grid,
            in_specs=[
                pl.BlockSpec((H, Dp), lambda i: (0, 0)),            # ml   (resident)
                pl.BlockSpec((bb * H, Dp), lambda i: (i, 0)),       # history rows
                pl.BlockSpec((bb * N, Dp), lambda i: (i, 0)),       # candidate rows
                pl.BlockSpec((Dp, Dp), lambda i: (0, 0)),           # wr   (resident)
                pl.BlockSpec((Dp, Dp), lambda i: (0, 0)),           # wqk  (K folded in)
                pl.BlockSpec((1, Dp), lambda i: (0, 0)),            # vqk
            ],
            out_specs=pl.BlockSpec((bb * N, Dp), lambda i: (i, 0)),
            scratch_shapes=[pltpu.VMEM((bb * H, Dp), act_dt)],      # gcn (bf16)
        ),
        compiler_params=pltpu.CompilerParams(
            dimension_semantics=("parallel",),
            vmem_limit_bytes=vmem_limit,
        ),
    )(ml, hist2, cand2, prep['wr'], prep['wqk'], prep['vqk'])

    # The padded D..Dp lanes are exact zeros; slice them off for the caller.
    return out2.reshape(B, N, Dp)[:, :, :D]


# --------------------------------------------------------------------------- #
# Pure-JAX reference (mirrors the PyTorch semantics, f32)
# --------------------------------------------------------------------------- #
def cider_reference(hist, cand, params, attention_dim):
    hist = hist.astype(jnp.float32)
    cand = cand.astype(jnp.float32)
    wl = params['wl'].astype(jnp.float32)
    bl = params['bl'].astype(jnp.float32)
    wr = params['wr'].astype(jnp.float32)
    wk = params['wk'].astype(jnp.float32)
    wq = params['wq'].astype(jnp.float32)
    bq = params['bq'].astype(jnp.float32)
    B, H, D = hist.shape
    mean_x = hist.mean(axis=0)                                    # [H, D]
    ml = mean_x @ wl + bl[0]
    mask = (jnp.arange(B) < H).astype(jnp.float32)[:, None, None]
    gcn = mask * ml[None] + jnp.einsum('bhd,de->bhe', hist, wr)
    k = jnp.einsum('bhd,da->bha', gcn, wk)
    q = jnp.einsum('bnd,da->bna', cand, wq) + bq[0]
    a = jnp.einsum('bna,bha->bnh', q, k) / math.sqrt(float(attention_dim))
    alpha = jax.nn.softmax(a, axis=-1)
    return jnp.einsum('bnh,bhd->bnd', alpha, gcn)


if __name__ == "__main__":
    # B=batch, H=max_history_num, N=news_num, D=news_embedding_dim, A=attention_dim.
    # (The PyTorch bipartite scatter requires batch_size >= max_history_num.)
    B, H, N, D, A = 12, 8, 4, 64, 32

    key = jax.random.PRNGKey(0)
    ks = jax.random.split(key, 6)

    def xavier(k, shape, dtype=jnp.float32):
        bound = math.sqrt(6.0 / (shape[0] + shape[1]))
        return jax.random.uniform(k, shape, jnp.float32, -bound, bound).astype(dtype)

    params = dict(
        wl=xavier(ks[0], (D, D)),                        # SAGEConv lin_l (wrapper-side, f32)
        bl=jnp.zeros((1, D), jnp.float32),
        wr=xavier(ks[1], (D, D), jnp.bfloat16),          # SAGEConv lin_r (no bias)
        wk=xavier(ks[2], (D, A), jnp.bfloat16),          # K projection   (no bias)
        wq=xavier(ks[3], (D, A), jnp.bfloat16),          # Q projection
        bq=jnp.zeros((1, A), jnp.float32),
    )

    history_embedding = jax.random.normal(ks[4], (B, H, D),
                                          jnp.float32).astype(jnp.bfloat16)
    candidate_news = jax.random.normal(ks[5], (B, N, D),
                                       jnp.float32).astype(jnp.bfloat16)

    prep = prepare_cider_params(params, attention_dim=A)
    out = cider_forward(history_embedding, candidate_news, prep)
    out = jax.block_until_ready(out)

    ref = cider_reference(history_embedding, candidate_news, params, attention_dim=A)
    assert out.shape == (B, N, D)
    out32 = out.astype(jnp.float32)
    max_err = float(jnp.max(jnp.abs(out32 - ref)))
    # bf16 MXU weights, the folded (Wq Wk^T)/sqrt(A) matrix quantized to bf16,
    # bf16 gcn reuse, EUP approx reciprocal in the softmax, and a bf16 output
    # store => looser tolerance than a pure-f32 comparison.
    assert jnp.allclose(out32, ref, atol=5e-2, rtol=5e-2), max_err

    print("KERNEL_OK")
</pallas_src>

<mosaic_0001>
module attributes {stable_mosaic.version = 11 : i64} {
  func.func @cider_kernel(%arg0: i32, %arg1: memref<8x128xf32, #tpu.memory_space<vmem>>, %arg2: memref<96x128xbf16, #tpu.memory_space<vmem>>, %arg3: memref<48x128xbf16, #tpu.memory_space<vmem>>, %arg4: memref<128x128xbf16, #tpu.memory_space<vmem>>, %arg5: memref<128x128xbf16, #tpu.memory_space<vmem>>, %arg6: memref<1x128xf32, #tpu.memory_space<vmem>>, %arg7: memref<48x128xbf16, #tpu.memory_space<vmem>>, %arg8: memref<96x128xbf16, #tpu.memory_space<vmem>>) attributes {dimension_semantics = [#tpu.dimension_semantics<parallel>], iteration_bounds = array<i64: 1>, scalar_prefetch = 0 : i64, scratch_operands = 1 : i64, tpu.core_type = #tpu.core_type<tc>, window_params = [{pipeline_mode = #tpu.pipeline_mode<synchronous>, transform_indices = @transform_0, window_bounds = array<i64: 8, 128>}, {transform_indices = @transform_1, window_bounds = array<i64: 96, 128>}, {transform_indices = @transform_2, window_bounds = array<i64: 48, 128>}, {pipeline_mode = #tpu.pipeline_mode<synchronous>, transform_indices = @transform_3, window_bounds = array<i64: 128, 128>}, {pipeline_mode = #tpu.pipeline_mode<synchronous>, transform_indices = @transform_4, window_bounds = array<i64: 128, 128>}, {pipeline_mode = #tpu.pipeline_mode<synchronous>, transform_indices = @transform_5, window_bounds = array<i64: 1, 128>}, {transform_indices = @transform_6, window_bounds = array<i64: 48, 128>}]} {
    %c0 = arith.constant 0 : index
    %c0_0 = arith.constant 0 : index
    %0 = vector.load %arg2[%c0, %c0_0] : memref<96x128xbf16, #tpu.memory_space<vmem>>, vector<96x128xbf16>
    %c0_1 = arith.constant 0 : index
    %c0_2 = arith.constant 0 : index
    %1 = vector.load %arg4[%c0_1, %c0_2] : memref<128x128xbf16, #tpu.memory_space<vmem>>, vector<128x128xbf16>
    %cst = arith.constant dense<0.000000e+00> : vector<96x128xf32>
    %2 = tpu.matmul %0, %1, %cst {dimension_numbers = #tpu.dot_dimension_numbers<[1], [0], [0], [1], [0, 0, 1, 1], [], []>} : vector<96x128xbf16>, vector<128x128xbf16>, vector<96x128xf32> -> vector<96x128xf32>
    %c12_i32 = arith.constant 12 : i32
    %3 = arith.muli %arg0, %c12_i32 : i32
    %c8_i32 = arith.constant 8 : i32
    %4 = arith.cmpi slt, %3, %c8_i32 : i32
    %5 = arith.extui %4 : i1 to i32
    %c0_i32 = arith.constant 0 : i32
    %6 = arith.cmpi ne, %5, %c0_i32 : i32
    scf.if %6 {
      %45 = tpu.iota {dimensions = array<i32: 0>} : vector<12x1x1xi32>
      %46 = vector.broadcast %3 : i32 to vector<12x1x1xi32>
      %47 = arith.addi %46, %45 : vector<12x1x1xi32>
      %c8_i32_20 = arith.constant 8 : i32
      %48 = vector.broadcast %c8_i32_20 : i32 to vector<12x1x1xi32>
      %49 = arith.cmpi slt, %47, %48 : vector<12x1x1xi32>
      %50 = arith.extui %49 : vector<12x1x1xi1> to vector<12x1x1xi32>
      %51 = arith.sitofp %50 : vector<12x1x1xi32> to vector<12x1x1xf32>
      %52 = vector.shape_cast %2 : vector<96x128xf32> to vector<12x8x128xf32>
      %c0_21 = arith.constant 0 : index
      %c0_22 = arith.constant 0 : index
      %53 = vector.load %arg1[%c0_21, %c0_22] : memref<8x128xf32, #tpu.memory_space<vmem>>, vector<8x128xf32>
      %54 = vector.shape_cast %53 : vector<8x128xf32> to vector<1x8x128xf32>
      %55 = vector.broadcast %51 : vector<12x1x1xf32> to vector<12x8x128xf32>
      %56 = vector.broadcast %54 : vector<1x8x128xf32> to vector<12x8x128xf32>
      %57 = arith.mulf %55, %56 : vector<12x8x128xf32>
      %58 = arith.addf %52, %57 : vector<12x8x128xf32>
      %59 = vector.shape_cast %58 : vector<12x8x128xf32> to vector<96x128xf32>
      %60 = arith.truncf %59 : vector<96x128xf32> to vector<96x128xbf16>
      %c0_23 = arith.constant 0 : index
      %c0_24 = arith.constant 0 : index
      %61 = vector.load %arg8[%c0_23, %c0_24] : memref<96x128xbf16, #tpu.memory_space<vmem>>, vector<96x128xbf16>
      tpu.vector_store %arg8[%c0_23, %c0_24], %60 {strides = array<i32>} : memref<96x128xbf16, #tpu.memory_space<vmem>>, vector<96x128xbf16>,
    } else {
    }
    %c8_i32_3 = arith.constant 8 : i32
    %7 = arith.cmpi sge, %3, %c8_i32_3 : i32
    %8 = arith.extui %7 : i1 to i32
    %c0_i32_4 = arith.constant 0 : i32
    %9 = arith.cmpi ne, %8, %c0_i32_4 : i32
    scf.if %9 {
      %45 = arith.truncf %2 : vector<96x128xf32> to vector<96x128xbf16>
      %c0_20 = arith.constant 0 : index
      %c0_21 = arith.constant 0 : index
      %46 = vector.load %arg8[%c0_20, %c0_21] : memref<96x128xbf16, #tpu.memory_space<vmem>>, vector<96x128xbf16>
      tpu.vector_store %arg8[%c0_20, %c0_21], %45 {strides = array<i32>} : memref<96x128xbf16, #tpu.memory_space<vmem>>, vector<96x128xbf16>,
    } else {
    }
    %c0_5 = arith.constant 0 : index
    %c0_6 = arith.constant 0 : index
    %10 = vector.load %arg3[%c0_5, %c0_6] : memref<48x128xbf16, #tpu.memory_space<vmem>>, vector<48x128xbf16>
    %c0_7 = arith.constant 0 : index
    %c0_8 = arith.constant 0 : index
    %11 = vector.load %arg5[%c0_7, %c0_8] : memref<128x128xbf16, #tpu.memory_space<vmem>>, vector<128x128xbf16>
    %cst_9 = arith.constant dense<0.000000e+00> : vector<48x128xf32>
    %12 = tpu.matmul %10, %11, %cst_9 {dimension_numbers = #tpu.dot_dimension_numbers<[1], [0], [0], [1], [0, 0, 1, 1], [], []>} : vector<48x128xbf16>, vector<128x128xbf16>, vector<48x128xf32> -> vector<48x128xf32>
    %c0_10 = arith.constant 0 : index
    %c0_11 = arith.constant 0 : index
    %13 = vector.load %arg6[%c0_10, %c0_11] : memref<1x128xf32, #tpu.memory_space<vmem>>, vector<1x128xf32>
    %14 = vector.broadcast %13 : vector<1x128xf32> to vector<48x128xf32>
    %15 = arith.addf %12, %14 : vector<48x128xf32>
    %16 = vector.shape_cast %15 : vector<48x128xf32> to vector<12x4x128xf32>
    %c0_12 = arith.constant 0 : index
    %c0_13 = arith.constant 0 : index
    %17 = vector.load %arg8[%c0_12, %c0_13] : memref<96x128xbf16, #tpu.memory_space<vmem>>, vector<96x128xbf16>
    %18 = vector.shape_cast %17 : vector<96x128xbf16> to vector<12x8x128xbf16>
    %19 = arith.extf %18 : vector<12x8x128xbf16> to vector<12x8x128xf32>
    %20 = vector.shape_cast %16 : vector<12x4x128xf32> to vector<12x4x1x128xf32>
    %21 = vector.shape_cast %19 : vector<12x8x128xf32> to vector<12x1x8x128xf32>
    %22 = vector.broadcast %20 : vector<12x4x1x128xf32> to vector<12x4x8x128xf32>
    %23 = vector.broadcast %21 : vector<12x1x8x128xf32> to vector<12x4x8x128xf32>
    %24 = arith.mulf %22, %23 : vector<12x4x8x128xf32>
    %cst_14 = arith.constant dense<0.000000e+00> : vector<12x4x8xf32>
    %25 = vector.multi_reduction <add>, %24, %cst_14 [3] : vector<12x4x8x128xf32> to vector<12x4x8xf32>
    %cst_15 = arith.constant dense<0xFF800000> : vector<12x4xf32>
    %26 = vector.multi_reduction <maximumf>, %25, %cst_15 [2] : vector<12x4x8xf32> to vector<12x4xf32>
    %27 = vector.shape_cast %26 : vector<12x4xf32> to vector<12x4x1xf32>
    %28 = vector.broadcast %27 : vector<12x4x1xf32> to vector<12x4x8xf32>
    %29 = arith.subf %25, %28 : vector<12x4x8xf32>
    %30 = math.exp %29 : vector<12x4x8xf32>
    %cst_16 = arith.constant dense<0.000000e+00> : vector<12x4xf32>
    %31 = vector.multi_reduction <add>, %30, %cst_16 [2] : vector<12x4x8xf32> to vector<12x4xf32>
    %32 = vector.shape_cast %31 : vector<12x4xf32> to vector<12x4x1xf32>
    %33 = tpu.reciprocal %32 {approx = true} : vector<12x4x1xf32> -> vector<12x4x1xf32>
    %34 = vector.broadcast %33 : vector<12x4x1xf32> to vector<12x4x8xf32>
    %35 = arith.mulf %30, %34 : vector<12x4x8xf32>
    %36 = vector.shape_cast %35 : vector<12x4x8xf32> to vector<12x4x8x1xf32>
    %37 = vector.shape_cast %19 : vector<12x8x128xf32> to vector<12x1x8x128xf32>
    %38 = vector.broadcast %36 : vector<12x4x8x1xf32> to vector<12x4x8x128xf32>
    %39 = vector.broadcast %37 : vector<12x1x8x128xf32> to vector<12x4x8x128xf32>
    %40 = arith.mulf %38, %39 : vector<12x4x8x128xf32>
    %cst_17 = arith.constant dense<0.000000e+00> : vector<12x4x128xf32>
    %41 = vector.multi_reduction <add>, %40, %cst_17 [2] : vector<12x4x8x128xf32> to vector<12x4x128xf32>
    %42 = vector.shape_cast %41 : vector<12x4x128xf32> to vector<48x128xf32>
    %43 = arith.truncf %42 : vector<48x128xf32> to vector<48x128xbf16>
    %c0_18 = arith.constant 0 : index
    %c0_19 = arith.constant 0 : index
    %44 = vector.load %arg7[%c0_18, %c0_19] : memref<48x128xbf16, #tpu.memory_space<vmem>>, vector<48x128xbf16>
    tpu.vector_store %arg7[%c0_18, %c0_19], %43 {strides = array<i32>} : memref<48x128xbf16, #tpu.memory_space<vmem>>, vector<48x128xbf16>,
    return
  }
  func.func @transform_0(%arg0: i32) -> (i32, i32) {
    %c0_i32 = arith.constant 0 : i32
    %c0_i32_0 = arith.constant 0 : i32
    %c0_i32_1 = arith.constant 0 : i32
    return %c0_i32, %c0_i32_0 : i32, i32
  }
  func.func @transform_1(%arg0: i32) -> (i32, i32) {
    %c0_i32 = arith.constant 0 : i32
    %c0_i32_0 = arith.constant 0 : i32
    return %arg0, %c0_i32 : i32, i32
  }
  func.func @transform_2(%arg0: i32) -> (i32, i32) {
    %c0_i32 = arith.constant 0 : i32
    %c0_i32_0 = arith.constant 0 : i32
    return %arg0, %c0_i32 : i32, i32
  }
  func.func @transform_3(%arg0: i32) -> (i32, i32) {
    %c0_i32 = arith.constant 0 : i32
    %c0_i32_0 = arith.constant 0 : i32
    %c0_i32_1 = arith.constant 0 : i32
    return %c0_i32, %c0_i32_0 : i32, i32
  }
  func.func @transform_4(%arg0: i32) -> (i32, i32) {
    %c0_i32 = arith.constant 0 : i32
    %c0_i32_0 = arith.constant 0 : i32
    %c0_i32_1 = arith.constant 0 : i32
    return %c0_i32, %c0_i32_0 : i32, i32
  }
  func.func @transform_5(%arg0: i32) -> (i32, i32) {
    %c0_i32 = arith.constant 0 : i32
    %c0_i32_0 = arith.constant 0 : i32
    %c0_i32_1 = arith.constant 0 : i32
    return %c0_i32, %c0_i32_0 : i32, i32
  }
  func.func @transform_6(%arg0: i32) -> (i32, i32) {
    %c0_i32 = arith.constant 0 : i32
    %c0_i32_0 = arith.constant 0 : i32
    return %arg0, %c0_i32 : i32, i32
  }
}

</mosaic_0001>

<bundles_post_ra>
// kernel: tpu_custom_call.1
= control target key start
LH: loop header
LB: loop body
LE: loop exit
PB: predicated region body
PF: predicated region fallthrough
CT: control target
= control target key end

     0   :  { %11 = vsyncpa [#allocation4], 0  ;;  %s5448_s0 = inlined_call_operand.hbm [shape: f32[8,128], index: 0, kind: input, shape index: {}]   ;;  %s5449_s1 = inlined_call_operand.hbm [shape: bf16[96,128], index: 1, kind: input, shape index: {}]   ;;  %s5450_s2 = inlined_call_operand.hbm [shape: bf16[48,128], index: 2, kind: input, shape index: {}]   ;;  %s5451_s3 = inlined_call_operand.hbm [shape: bf16[128,128], index: 3, kind: input, shape index: {}]   ;;  %s5452_s4 = inlined_call_operand.hbm [shape: bf16[128,128], index: 4, kind: input, shape index: {}]   ;;  %s5453_s5 = inlined_call_operand.hbm [shape: f32[1,128], index: 5, kind: input, shape index: {}]   ;;  %s5454_s6 = inlined_call_operand.hbm [shape: bf16[48,128], index: 6, kind: output, shape index: {}]  }
   0x1   :  { %12 = vsyncpa [#allocation7], 0 }
   0x2   :  { %13 = vsyncpa [#allocation10], 0 }
   0x3   :  { %14 = vsyncpa [#allocation13], 0 }
   0x4   :  { %15 = vsyncpa [#allocation5], 0  ;;  %s4255_s21 = smov [#allocation6]   ;;  %s4091_s25 = scalar_lea.hbm %s5449_s1, 768 }
   0x5   :  { %s31_s22 = sshll.u32 %s4255_s21, 4  ;;  %p4092_p0 = scmp.ne.s32.totalorder %s5449_s1, %s4091_s25  ;;  %s32_s22 = int_to_ptr.vmem [resolvable:$true] %s31_s22 }
   0x6   :  { %p4095_p1 = scmp.lt.u32.totalorder %s4091_s25, %s5449_s1 }
   0x8   :  { %p4097_p2 = pnand %p4095_p1, %p4092_p0 }
   0xa   :  { %4100 = shalt.err (!%p4097_p2)
}
   0xb   :  { %s4101_s30 = scalar_lea.vmem %s32_s22, 768  ;;  %p4106_p4 = scmp.lt.s32.totalorder %s32_s22, %s32_s22 }
   0xc   :  { %p4102_p3 = scmp.ne.s32.totalorder %s32_s22, %s4101_s30  ;;  %p4107_p5 = scmp.lt.s32.totalorder %s4101_s30, %s4101_s30 }
   0xe   :  { %p4108_p6 = por %p4107_p5, %p4106_p4 }
  0x10   :  { %p4109_p7 = pnand %p4108_p6, %p4102_p3 }
  0x12   :  { %4112 = shalt.err (!%p4109_p7)
}
  0x13   :  { %s4256_s7 = smov 64   ;;  %s4257_s8 = smov 4  }
  0x14   :  { %37 = dma.hbm_to_vmem [thread:$0]  %s5449_s1, 768, %s32_s22, [#allocation7], %s4256_s7, %s4256_s7, %s4257_s8  }
  0x15   :  { %s4258_s11 = smov [#allocation9]   ;;  %s4259_s13 = smov [#allocation3]  }
  0x16   :  { %s55_s12 = sshll.u32 %s4258_s11, 4  ;;  %s22_s14 = sshll.u32 %s4259_s13, 4  ;;  %s56_s12 = int_to_ptr.vmem [resolvable:$true] %s55_s12  ;;  %s23_s14 = int_to_ptr.vmem [resolvable:$true] %s22_s14 }
  0x17   :  { %s4113_s17 = scalar_lea.hbm %s5451_s3, 1024 }
  0x18   :  { %p4114_p8 = scmp.ne.s32.totalorder %s5451_s3, %s4113_s17  ;;  %p4117_p9 = scmp.lt.u32.totalorder %s4113_s17, %s5451_s3 }
  0x1a   :  { %p4119_p10 = pnand %p4117_p9, %p4114_p8 }
  0x1c   :  { %4122 = shalt.err (!%p4119_p10)
}
  0x1d   :  { %s4123_s1 = scalar_lea.vmem %s56_s12, 1024  ;;  %p4128_p12 = scmp.lt.s32.totalorder %s56_s12, %s56_s12 }
  0x1e   :  { %p4124_p11 = scmp.ne.s32.totalorder %s56_s12, %s4123_s1  ;;  %p4129_p13 = scmp.lt.s32.totalorder %s4123_s1, %s4123_s1 }
  0x20   :  { %p4130_p0 = por %p4129_p13, %p4128_p12 }
  0x22   :  { %p4131_p1 = pnand %p4130_p0, %p4124_p11 }
  0x24   :  { %4134 = shalt.err (!%p4131_p1)
}
  0x25   :  { %61 = dma.hbm_to_vmem [thread:$0]  %s5451_s3, 1024, %s56_s12, [#allocation10], %s4256_s7, %s4256_s7, %s4257_s8  }
  0x26   :  { %s4135_s26 = scalar_lea.hbm %s5448_s0, 128 }
  0x27   :  { %p4136_p2 = scmp.ne.s32.totalorder %s5448_s0, %s4135_s26  ;;  %p4139_p3 = scmp.lt.u32.totalorder %s4135_s26, %s5448_s0 }
  0x29   :  { %p4141_p4 = pnand %p4139_p3, %p4136_p2 }
  0x2b   :  { %4144 = shalt.err (!%p4141_p4)
}
  0x2c   :  { %s4145_s9 = scalar_lea.vmem %s23_s14, 128  ;;  %p4150_p6 = scmp.lt.s32.totalorder %s23_s14, %s23_s14 }
  0x2d   :  { %p4146_p5 = scmp.ne.s32.totalorder %s23_s14, %s4145_s9  ;;  %p4151_p7 = scmp.lt.s32.totalorder %s4145_s9, %s4145_s9 }
  0x2f   :  { %p4152_p8 = por %p4151_p7, %p4150_p6 }
  0x31   :  { %p4153_p9 = pnand %p4152_p8, %p4146_p5 }
  0x33   :  { %4156 = shalt.err (!%p4153_p9)
}
  0x34   :  { %25 = dma.hbm_to_vmem [thread:$0]  %s5448_s0, 128, %s23_s14, [#allocation4]  }
  0x35   :  { %s4260_s11 = smov [#allocation8]   ;;  %s4261_s13 = smov [#allocation11]  }
  0x36   :  { %s43_s12 = sshll.u32 %s4260_s11, 4  ;;  %s67_s15 = sshll.u32 %s4261_s13, 4  ;;  %s44_s12 = int_to_ptr.vmem [resolvable:$true] %s43_s12  ;;  %s68_s15 = int_to_ptr.vmem [resolvable:$true] %s67_s15 }
  0x37   :  { %s4157_s18 = scalar_lea.hbm %s5450_s2, 384 }
  0x38   :  { %p4158_p10 = scmp.ne.s32.totalorder %s5450_s2, %s4157_s18  ;;  %p4161_p11 = scmp.lt.u32.totalorder %s4157_s18, %s5450_s2 }
  0x3a   :  { %p4163_p12 = pnand %p4161_p11, %p4158_p10 }
  0x3c   :  { %4166 = shalt.err (!%p4163_p12)
}
  0x3d   :  { %s4167_s0 = scalar_lea.vmem %s44_s12, 384  ;;  %p4172_p0 = scmp.lt.s32.totalorder %s44_s12, %s44_s12 }
  0x3e   :  { %p4168_p13 = scmp.ne.s32.totalorder %s44_s12, %s4167_s0  ;;  %p4173_p1 = scmp.lt.s32.totalorder %s4167_s0, %s4167_s0 }
  0x40   :  { %p4174_p2 = por %p4173_p1, %p4172_p0 }
  0x42   :  { %p4175_p3 = pnand %p4174_p2, %p4168_p13 }
  0x44   :  { %4178 = shalt.err (!%p4175_p3)
}
  0x45   :  { %49 = dma.hbm_to_vmem [thread:$0]  %s5450_s2, 384, %s44_s12, [#allocation7], %s4256_s7, %s4256_s7, %s4257_s8  }
  0x46   :  { %s4179_s25 = scalar_lea.hbm %s5452_s4, 1024 }
  0x47   :  { %p4180_p4 = scmp.ne.s32.totalorder %s5452_s4, %s4179_s25  ;;  %p4183_p5 = scmp.lt.u32.totalorder %s4179_s25, %s5452_s4 }
  0x49   :  { %p4185_p6 = pnand %p4183_p5, %p4180_p4 }
  0x4b   :  { %4188 = shalt.err (!%p4185_p6)
}
  0x4c   :  { %s4189_s30 = scalar_lea.vmem %s68_s15, 1024  ;;  %p4194_p8 = scmp.lt.s32.totalorder %s68_s15, %s68_s15 }
  0x4d   :  { %p4190_p7 = scmp.ne.s32.totalorder %s68_s15, %s4189_s30  ;;  %p4195_p9 = scmp.lt.s32.totalorder %s4189_s30, %s4189_s30 }
  0x4f   :  { %p4196_p10 = por %p4195_p9, %p4194_p8 }
  0x51   :  { %p4197_p11 = pnand %p4196_p10, %p4190_p7 }
  0x53   :  { %4200 = shalt.err (!%p4197_p11)
}
  0x54   :  { %73 = dma.hbm_to_vmem [thread:$0]  %s5452_s4, 1024, %s68_s15, [#allocation10], %s4256_s7, %s4256_s7, %s4257_s8  }
  0x55   :  { %s4262_s3 = smov [#allocation12]   ;;  %s4201_s13 = scalar_lea.hbm %s5453_s5, 16 }
  0x56   :  { %s80_s10 = sshll.u32 %s4262_s3, 4  ;;  %p4202_p12 = scmp.ne.s32.totalorder %s5453_s5, %s4201_s13  ;;  %s81_s10 = int_to_ptr.vmem [resolvable:$true] %s80_s10 }
  0x57   :  { %p4205_p13 = scmp.lt.u32.totalorder %s4201_s13, %s5453_s5 }
  0x59   :  { %p4207_p0 = pnand %p4205_p13, %p4202_p12 }
  0x5b   :  { %4210 = shalt.err (!%p4207_p0)
}
  0x5c   :  { %s4211_s20 = scalar_lea.vmem %s81_s10, 16  ;;  %s4215_s4 = scalar_lea.vmem %s81_s10, 32 }
  0x5d   :  { %p4212_p1 = scmp.ne.s32.totalorder %s81_s10, %s4211_s20  ;;  %p4216_p2 = scmp.lt.s32.totalorder %s81_s10, %s81_s10 }
  0x5e   :  { %p4217_p3 = scmp.lt.s32.totalorder %s4215_s4, %s4211_s20 }
  0x60   :  { %p4218_p4 = por %p4217_p3, %p4216_p2 }
  0x62   :  { %p4219_p5 = pnand %p4218_p4, %p4212_p1 }
  0x64   :  { %4222 = shalt.err (!%p4219_p5)
}
  0x65   :  { %83 = dma.hbm_to_vmem [thread:$0]  %s5453_s5, 16, %s81_s10, [#allocation13]  }
  0x66   :  { %4245 = dma.done.wait [#allocation4], 128  }
  0x67   :  { %4246 = vsyncadd [#allocation4], 4294967168 }
  0x68   :  { %4247 = dma.done.wait [#allocation7], 1152  }
  0x69   :  { %4248 = vsyncadd [#allocation7], 4294966144 }
  0x6a   :  { %4249 = dma.done.wait [#allocation10], 2048  }
  0x6b   :  { %4250 = vsyncadd [#allocation10], 4294965248 }
  0x6c   :  { %4251 = dma.done.wait [#allocation13], 16  }
  0x6d   :  { %4252 = vsyncadd [#allocation13], 4294967280  ;;  %v4263_v0 = vmov 0.0   ;;  %vm4264_vm0 = vmmov 0   ;;  %v3946_v1 = vld [vmem:[#allocation9] sm:$0xff]   ;;  %v3948_v3 = vld [vmem:[#allocation9 + $0x8] sm:$0xff]   ;;  %v624_v28 = vlaneseq }
  0x6e   :  { %3903 = vmatprep.subr.bf16.mxu1 %v4263_v0  ;;  %3919 = vmatprep.mubr.msk.bf16.mxu1 %vm4264_vm0, %v4263_v0  ;;  %v3947_v2 = vld [vmem:[#allocation11] sm:$0xff]   ;;  %v3949_v4 = vld [vmem:[#allocation11 + $0x8] sm:$0xff]   ;;  %v3950_v5 = vld [vmem:[#allocation9 + $0x10] sm:$0xff]   ;;  %v4265_v26 = vmov 1966171168   ;;  %vm1540_vm1 = vcmask 1041409  }
  0x6f   :  { %3875 = vmatprep.subr.bf16.mxu0 %v3946_v1  ;;  %3904 = vmatpush3.bf16.msra.mxu1 %v3947_v2  ;;  %v3951_v6 = vld [vmem:[#allocation11 + $0x10] sm:$0xff]   ;;  %v3952_v7 = vld [vmem:[#allocation9 + $0x18] sm:$0xff]   ;;  %v3954_v9 = vld [vmem:[#allocation9 + $0x20] sm:$0xff]   ;;  %v622_v27 = vunpack.c.l.s4 %v4265_v26  ;;  %v4402_v30 = vshrl.u32 %v624_v28, 7  ;;  %vm1542_vm2 = vcmask 1042434   ;;  %vm1544_vm3 = vcmask 1043459  }
  0x70   :  { %3876 = vmatpush3.bf16.msra.mxu0 %v3946_v1  ;;  %3905 = vmatprep.subr.bf16.mxu1 %v4263_v0  ;;  %v3953_v8 = vld [vmem:[#allocation11 + $0x18] sm:$0xff]   ;;  %v3955_v10 = vld [vmem:[#allocation11 + $0x20] sm:$0xff]   ;;  %v3956_v11 = vld [vmem:[#allocation9 + $0x28] sm:$0xff]   ;;  %vm1591_vm4 = vcmask 60416   ;;  %vm3623_vm5 = vcmask 1044484   ;;  %vm3625_vm6 = vcmask 1045509  }
  0x71   :  { %3877 = vmatprep.subr.bf16.mxu0 %v3948_v3  ;;  %v3962_v12 = vld [vmem:[#allocation6] sm:$0xff]   ;;  %v3957_v13 = vld [vmem:[#allocation11 + $0x28] sm:$0xff]   ;;  %v3958_v14 = vld [vmem:[#allocation9 + $0x30] sm:$0xff]   ;;  %v623_v29 = vunpack.c.0.s8 %v622_v27  ;;  %v4419_v50 = vsub.s32 0, %v4402_v30  ;;  %vm3627_vm7 = vcmask 1046534   ;;  %vm3629_vm8 = vcmask 1047559  }
  0x72   :  { %3891 = vmatprep.mubr.bf16.mxu0 %v3962_v12  ;;  %v3959_v15 = vld [vmem:[#allocation11 + $0x30] sm:$0xff]   ;;  %v3960_v16 = vld [vmem:[#allocation9 + $0x38] sm:$0xff]   ;;  %v3963_v18 = vld [vmem:[#allocation8] sm:$0xff]   ;;  %s4267_s5 = smov [#allocation14]  }
  0x73   :  { %3906 = vmatpush3.bf16.msra.mxu1 %v3949_v4  ;;  %v3961_v17 = vld [vmem:[#allocation11 + $0x38] sm:$0xff]   ;;  %v3964_v19 = vld [vmem:[#allocation6 + $0x8] sm:$0xff]   ;;  %v3965_v20 = vld [vmem:[#allocation6 + $0x10] sm:$0xff]   ;;  %v4407_v32 = vsub.s32 %v623_v29, %v4402_v30  ;;  %s3689_s1 = sshll.u32 %s4267_s5, 4  ;;  %s3690_s1 = int_to_ptr.vmem [resolvable:$true] %s3689_s1 }
  0x74   :  { %3878 = vmatpush3.bf16.msra.mxu0 %v3948_v3  ;;  %3907 = vmatprep.subr.bf16.mxu1 %v4263_v0  ;;  %v3966_v21 = vld [vmem:[#allocation8 + $0x8] sm:$0xff]   ;;  %v3968_v23 = vld [vmem:[#allocation6 + $0x20] sm:$0xff]   ;;  %v3970_v25 = vld [vmem:[#allocation6 + $0x28] sm:$0xff]   ;;  %s4223_s0 = scalar_lea.vmem %s3690_s1, 384  ;;  %p4228_p7 = scmp.lt.s32.totalorder %s3690_s1, %s3690_s1 }
  0x75   :  { %3879 = vmatprep.subr.bf16.mxu0 %v3950_v5  ;;  %v3967_v22 = vld [vmem:[#allocation6 + $0x18] sm:$0xff]   ;;  %v3969_v24 = vld [vmem:[#allocation8 + $0x10] sm:$0xff]   ;;  %v4404_v31 = vld [vmem:[#allocation12] ss:$0 sm:$0xff]  ;;  %p4224_p6 = scmp.ne.s32.totalorder %s3690_s1, %s4223_s0  ;;  %p4229_p8 = scmp.lt.s32.totalorder %s4223_s0, %s4223_s0 }
  0x76   :  { %v4409_v33 = vld [vmem:[#allocation3] sm:$0xff] }
  0x77   :  { %3908 = vmatpush3.bf16.msra.mxu1 %v3951_v6  ;;  %p4230_p9 = por %p4229_p8, %p4228_p7 }
  0x78   :  { %3880 = vmatpush3.bf16.msra.mxu0 %v3950_v5  ;;  %3909 = vmatprep.subr.bf16.mxu1 %v4263_v0 }
  0x79   :  { %3881 = vmatprep.subr.bf16.mxu0 %v3952_v7  ;;  %p4231_p10 = pnand %p4230_p9, %p4224_p6 }
  0x7b   :  { %3910 = vmatpush3.bf16.msra.mxu1 %v3953_v8 }
  0x7c   :  { %3882 = vmatpush3.bf16.msra.mxu0 %v3952_v7  ;;  %3911 = vmatprep.subr.bf16.mxu1 %v4263_v0 }
  0x7d   :  { %3883 = vmatprep.subr.bf16.mxu0 %v3954_v9 }
  0x7f   :  { %3912 = vmatpush3.bf16.msra.mxu1 %v3955_v10 }
  0x80   :  { %3884 = vmatpush3.bf16.msra.mxu0 %v3954_v9  ;;  %3913 = vmatprep.subr.bf16.mxu1 %v4263_v0 }
  0x81   :  { %3885 = vmatprep.subr.bf16.mxu0 %v3956_v11 }
  0x83   :  { %3914 = vmatpush3.bf16.msra.mxu1 %v3957_v13 }
  0x84   :  { %3886 = vmatpush3.bf16.msra.mxu0 %v3956_v11  ;;  %3915 = vmatprep.subr.bf16.mxu1 %v4263_v0 }
  0x85   :  { %3887 = vmatprep.subr.bf16.mxu0 %v3958_v14 }
  0x87   :  { %3916 = vmatpush3.bf16.msra.mxu1 %v3959_v15 }
  0x88   :  { %3888 = vmatpush3.bf16.msra.mxu0 %v3958_v14  ;;  %3917 = vmatprep.subr.bf16.mxu1 %v4263_v0 }
  0x89   :  { %3889 = vmatprep.subr.bf16.mxu0 %v3960_v16 }
  0x8b   :  { %3918 = vmatpush3.bf16.msra.mxu1 %v3961_v17 }
  0x8c   :  { %3890 = vmatpush3.bf16.msra.mxu0 %v3960_v16 }
  0x8e   :  { %3920 = vmatmul.mubr.bf16.vlgmr.msra.gmra.mrb[0].mxu1 %v3963_v18 }
  0x8f   :  { %3892 = vmatmul.mubr.bf16.vlgmr.msra.gmra.mrb[0].mxu0 %v3964_v19  ;;  %3923 = vmatprep.mubr.msk.bf16.mxu1 %vm4264_vm0, %v4263_v0 }
  0x90   :  { %3895 = vmatprep.mubr.bf16.mxu0 %v3965_v20 }
  0x96   :  { %3924 = vmatmul.mubr.bf16.gmra.mrb[4].mxu1 %v3966_v21 }
  0x97   :  { %3896 = vmatmul.mubr.bf16.gmra.mrb[4].mxu0 %v3967_v22  ;;  %3927 = vmatprep.mubr.msk.bf16.mxu1 %vm4264_vm0, %v4263_v0 }
  0x98   :  { %3899 = vmatprep.mubr.bf16.mxu0 %v3968_v23 }
  0x9e   :  { %3928 = vmatmul.mubr.bf16.gmra.mrb[8].mxu1 %v3969_v24 }
  0x9f   :  { %3900 = vmatmul.mubr.bf16.gmra.mrb[8].mxu0 %v3970_v25 }
 0x161   :  { %v531_v34 = vpop.f32.mrb[0].mxu1 }
 0x162   :  { %v3893_v35 = vpop.f32.mrb[0].mxu0  ;;  %v532_v36 = vadd.f32 %v4404_v31, %v531_v34  ;;  %v3921_v37 = vpop.f32.mrb[1].mxu1 }
 0x163   :  { %v249_v38 = vpop.f32.mrb[1].mxu0  ;;  %v534_v40 = vpop.f32.mrb[2].mxu1  ;;  %v364_v9 = vadd.f32 %v3893_v35, %v4409_v33 }
 0x164   :  { %v362_v39 = vadd.f32 %v4409_v33, %v249_v38  ;;  %v4413_v41 = vpop.f32.mrb[2].mxu0  ;;  %v620_v42 = vcombine.high %v532_v36, %v532_v36  ;;  %v627_v43 = vrot.slane %v532_v36, %v4407_v32  ;;  %v3922_v44 = vpop.f32.mrb[3].mxu1  ;;  %v535_v49 = vadd.f32 %v4404_v31, %v534_v40 }
 0x165   :  { %v252_v45 = vpop.f32.mrb[3].mxu0  ;;  %v3840_v21 = vpack.c.bf16 %v364_v9, %v364_v9 }
 0x166   :  { %v3838_v46 = vpack.c.bf16 %v362_v39, %v362_v39  ;;  %v634_v47 = vrot.slane %v620_v42, %v4407_v32  ;;  %v635_v48 = vcombine.high %v627_v43, %v627_v43  ;;  %v363_v51 = vadd.f32 %v4409_v33, %v252_v45 }
 0x167   :  { %v643_v53 = vrot.slane %v627_v43, %v4407_v32  ;;  %v676_v58 = vrot.slane %v535_v49, %v4407_v32  ;;  %v669_v18 = vcombine.high %v535_v49, %v535_v49  ;;  %v4463_v40 = vunpack.c.l.bf16 %v3840_v21 }
 0x168   :  { %v4422_v52 = vunpack.c.l.bf16 %v3838_v46  ;;  %v657_v54 = vrot.slane %v635_v48, %v4407_v32  ;;  %v636_v57 = vcombine.high %v634_v47, %v634_v47  ;;  %v3839_v63 = vpack.c.bf16 %v363_v51, %v363_v51 }
 0x169   :  { %v539_v55 = vpop.f32.mrb[4].mxu1  ;;  %v917_v59 = vrot.slane %v643_v53, %v4419_v50  ;;  %v665_v60 = vcombine.high %v643_v53, %v643_v53  ;;  %v650_v6 = vrot.slane %v634_v47, %v4407_v32  ;;  %v684_v10 = vcombine.high %v676_v58, %v676_v58  ;;  %5494 = vst [vmem:[#allocation22_spill] sm:$0xff] %v4463_v40 }
 0x16a   :  { %5492 = vst [vmem:[#allocation20_spill] sm:$0xff] %v4422_v52  ;;  %v4426_v56 = vpop.f32.mrb[4].mxu0  ;;  %v3925_v61 = vpop.f32.mrb[5].mxu1  ;;  %v667_v0 = vcombine.high %v657_v54, %v657_v54  ;;  %v921_v5 = vrot.slane %v657_v54, %v4419_v50  ;;  %v664_v13 = vrot.slane %v636_v57, %v4407_v32  ;;  %v692_v14 = vrot.slane %v676_v58, %v4407_v32 }
 0x16b   :  { %v265_v62 = vpop.f32.mrb[5].mxu0  ;;  %v4430_v1 = vpop.f32.mrb[6].mxu1  ;;  %v1154_v3 = vmul.f32 %v917_v59, %v4422_v52  ;;  %v925_v4 = vrot.slane %v665_v60, %v4419_v50  ;;  %v4445_v15 = vunpack.c.l.bf16 %v3839_v63  ;;  %v933_v17 = vrot.slane %v650_v6, %v4419_v50 }
 0x16c   :  { %v4432_v2 = vpop.f32.mrb[6].mxu0  ;;  %v3926_v7 = vpop.f32.mrb[7].mxu1  ;;  %v929_v12 = vrot.slane %v667_v0, %v4419_v50  ;;  %v1155_v16 = vmul.f32 %v921_v5, %v4422_v52  ;;  %v937_v23 = vrot.slane %v664_v13, %v4419_v50  ;;  %v706_v24 = vrot.slane %v684_v10, %v4407_v32 }
 0x16d   :  { %v4438_v8 = vpop.f32.mrb[7].mxu0  ;;  %1202 = vadd.xlane.f32.xlu0 %v1154_v3  ;;  %v1156_v11 = vmul.f32 %v925_v4, %v4422_v52  ;;  %5493 = vst [vmem:[#allocation21_spill] sm:$0xff] %v4445_v15  ;;  %v1158_v34 = vmul.f32 %v933_v17, %v4445_v15  ;;  %v949_v35 = vrot.slane %v692_v14, %v4419_v50 }
 0x16e   :  { %v1157_v22 = vmul.f32 %v929_v12, %v4422_v52  ;;  %v666_v36 = vcombine.high %v650_v6, %v650_v6  ;;  %v683_v39 = vrot.slane %v669_v18, %v4407_v32  ;;  %v1159_v42 = vmul.f32 %v937_v23, %v4445_v15 }
 0x16f   :  { %1206 = vadd.xlane.f32.xlu1 %v1156_v11  ;;  %v953_v43 = vrot.slane %v706_v24, %v4419_v50  ;;  %v668_v44 = vcombine.high %v664_v13, %v664_v13  ;;  %v1162_v45 = vmul.f32 %v949_v35, %v4463_v40  ;;  %v714_v47 = vcombine.high %v692_v14, %v692_v14 }
 0x170   :  { %v941_v46 = vrot.slane %v666_v36, %v4419_v50  ;;  %v540_v48 = vadd.f32 %v4404_v31, %v539_v55  ;;  %v685_v49 = vcombine.high %v683_v39, %v683_v39  ;;  %v365_v51 = vadd.f32 %v4413_v41, %v4409_v33 }
 0x171   :  { %v547_v19 = vpop.f32.mrb[8].mxu1  ;;  %1204 = vadd.xlane.f32.xlu0 %v1155_v16  ;;  %v1163_v53 = vmul.f32 %v953_v43, %v4463_v40  ;;  %v945_v54 = vrot.slane %v668_v44, %v4419_v50  ;;  %v716_v57 = vcombine.high %v706_v24, %v706_v24  ;;  %v366_v58 = vadd.f32 %v4409_v33, %v265_v62 }
 0x172   :  { %v4449_v20 = vpop.f32.mrb[8].mxu0  ;;  %v3929_v25 = vpop.f32.mrb[9].mxu1  ;;  %v699_v59 = vrot.slane %v683_v39, %v4407_v32  ;;  %v1160_v60 = vmul.f32 %v941_v46, %v4445_v15  ;;  %v957_v61 = vrot.slane %v714_v47, %v4419_v50  ;;  %v725_v55 = vrot.slane %v540_v48, %v4407_v32 }
 0x173   :  { %v4454_v26 = vpop.f32.mrb[9].mxu0  ;;  %v550_v27 = vpop.f32.mrb[10].mxu1  ;;  %1208 = vadd.xlane.f32.xlu1 %v1157_v22  ;;  %v3841_v63 = vpack.c.bf16 %v365_v51, %v365_v51  ;;  %v713_v41 = vrot.slane %v685_v49, %v4407_v32  ;;  %v1161_v0 = vmul.f32 %v945_v54, %v4445_v15  ;;  %v961_v3 = vrot.slane %v716_v57, %v4419_v50 }
 0x174   :  { %v4456_v29 = vpop.f32.mrb[10].mxu0  ;;  %v3930_v37 = vpop.f32.mrb[11].mxu1  ;;  %v3842_v4 = vpack.c.bf16 %v366_v58, %v366_v58  ;;  %v965_v62 = vrot.slane %v699_v59, %v4419_v50  ;;  %v1164_v5 = vmul.f32 %v957_v61, %v4463_v40  ;;  %v733_v6 = vcombine.high %v725_v55, %v725_v55 }
 0x175   :  { %v4460_v38 = vpop.f32.mrb[11].mxu0  ;;  %1210 = vadd.xlane.f32.xlu0 %v1158_v34  ;;  %v715_v7 = vcombine.high %v699_v59, %v699_v59  ;;  %v4484_v9 = vunpack.c.l.bf16 %v3841_v63  ;;  %v741_v10 = vrot.slane %v725_v55, %v4407_v32  ;;  %v969_v11 = vrot.slane %v713_v41, %v4419_v50 }
 0x176   :  { %v1165_v12 = vmul.f32 %v961_v3, %v4463_v40  ;;  %v717_v13 = vcombine.high %v713_v41, %v713_v41  ;;  %v548_v14 = vadd.f32 %v4404_v31, %v547_v19  ;;  %v718_v16 = vcombine.high %v540_v48, %v540_v48 }
 0x177   :  { %1212 = vadd.xlane.f32.xlu1 %v1159_v42  ;;  %5495 = vst [vmem:[#allocation23_spill] sm:$0xff] %v4484_v9  ;;  %v4490_v17 = vunpack.c.l.bf16 %v3842_v4  ;;  %v1166_v18 = vmul.f32 %v965_v62, %v4484_v9  ;;  %v973_v21 = vrot.slane %v715_v7, %v4419_v50  ;;  %v755_v22 = vrot.slane %v733_v6, %v4407_v32 }
 0x178   :  { %v816_v23 = vcombine.high %v548_v14, %v548_v14  ;;  %v823_v24 = vrot.slane %v548_v14, %v4407_v32  ;;  %v1167_v25 = vmul.f32 %v969_v11, %v4484_v9  ;;  %v367_v34 = vadd.f32 %v4409_v33, %v4438_v8 }
 0x179   :  { %1218 = vadd.xlane.f32.xlu0 %v1162_v45  ;;  %5496 = vst [vmem:[#allocation24_spill] sm:$0xff] %v4490_v17  ;;  %v981_v19 = vrot.slane %v741_v10, %v4419_v50  ;;  %v551_v35 = vadd.f32 %v4404_v31, %v550_v27  ;;  %v977_v36 = vrot.slane %v717_v13, %v4419_v50 }
 0x17a   :  { %v763_v37 = vcombine.high %v741_v10, %v741_v10  ;;  %v830_v39 = vrot.slane %v816_v23, %v4407_v32  ;;  %v4504_v42 = vrot.slane %v823_v24, %v4407_v32  ;;  %v732_v43 = vrot.slane %v718_v16, %v4407_v32 }
 0x17b   :  { %1220 = vadd.xlane.f32.xlu1 %v1163_v53  ;;  %v543_v44 = vadd.f32 %v4404_v31, %v4430_v1  ;;  %v865_v45 = vcombine.high %v551_v35, %v551_v35  ;;  %v1168_v8 = vmul.f32 %v973_v21, %v4484_v9  ;;  %v985_v27 = vrot.slane %v755_v22, %v4419_v50 }
 0x17c   :  { %v765_v46 = vcombine.high %v755_v22, %v755_v22  ;;  %v872_v47 = vrot.slane %v551_v35, %v4407_v32  ;;  %v3843_v48 = vpack.c.bf16 %v367_v34, %v367_v34  ;;  %v1170_v49 = vmul.f32 %v981_v19, %v4490_v17 }
 0x17d   :  { %1214 = vadd.xlane.f32.xlu0 %v1160_v60  ;;  %v831_v51 = vcombine.high %v823_v24, %v823_v24  ;;  %v879_v53 = vrot.slane %v865_v45, %v4407_v32  ;;  %v1169_v54 = vmul.f32 %v977_v36, %v4484_v9  ;;  %v989_v31 = vrot.slane %v763_v37, %v4419_v50 }
 0x17e   :  { %v832_v1 = vcombine.high %v830_v39, %v830_v39  ;;  %v4517_v57 = vrot.slane %v872_v47, %v4407_v32  ;;  %v734_v58 = vcombine.high %v732_v43, %v732_v43  ;;  %v368_v59 = vadd.f32 %v4426_v56, %v4409_v33 }
 0x17f   :  { %1216 = vadd.xlane.f32.xlu1 %v1161_v0  ;;  %v774_v60 = vrot.slane %v543_v44, %v4407_v32  ;;  %v1171_v61 = vmul.f32 %v985_v27, %v4490_v17  ;;  %v993_v55 = vrot.slane %v765_v46, %v4419_v50  ;;  %v748_v63 = vrot.slane %v732_v43, %v4407_v32 }
 0x180   :  { %v4525_v41 = vunpack.c.l.bf16 %v3843_v48  ;;  %v880_v0 = vcombine.high %v872_v47, %v872_v47  ;;  %v4528_v3 = vrot.slane %v831_v51, %v4407_v32  ;;  %v1172_v4 = vmul.f32 %v989_v31, %v4490_v17 }
 0x181   :  { %1222 = vadd.xlane.f32.xlu0 %v1164_v5  ;;  %v997_v56 = vrot.slane %v748_v63, %v4419_v50  ;;  %v4533_v62 = vrot.slane %v830_v39, %v4407_v32  ;;  %v4536_v5 = vrot.slane %v832_v1, %v4407_v32  ;;  %v3844_v6 = vpack.c.bf16 %v368_v59, %v368_v59 }
 0x182   :  { %5497 = vst [vmem:[#allocation25_spill] sm:$0xff] %v4525_v41  ;;  %v782_v7 = vcombine.high %v774_v60, %v774_v60  ;;  %v1173_v10 = vmul.f32 %v993_v55, %v4490_v17  ;;  %v762_v11 = vrot.slane %v734_v58, %v4407_v32  ;;  %v790_v13 = vrot.slane %v774_v60, %v4407_v32 }
 0x183   :  { %1224 = vadd.xlane.f32.xlu1 %v1165_v12  ;;  %v881_v12 = vcombine.high %v879_v53, %v879_v53  ;;  %v4542_v14 = vrot.slane %v880_v0, %v4407_v32  ;;  %v767_v16 = vcombine.high %v543_v44, %v543_v44  ;;  %v4546_v22 = vunpack.c.l.bf16 %v3844_v6 }
 0x184   :  { %v1001_v21 = vrot.slane %v762_v11, %v4419_v50  ;;  %v1013_v23 = vrot.slane %v790_v13, %v4419_v50  ;;  %v804_v24 = vrot.slane %v782_v7, %v4407_v32  ;;  %v4551_v34 = vrot.slane %v879_v53, %v4407_v32 }
 0x185   :  { %1226 = vadd.xlane.f32.xlu0 %v1166_v18  ;;  %v1174_v18 = vmul.f32 %v997_v56, %v4525_v41  ;;  %5498 = vst [vmem:[#allocation26_spill] sm:$0xff] %v4546_v22  ;;  %v4554_v19 = vrot.slane %v881_v12, %v4407_v32  ;;  %v781_v35 = vrot.slane %v767_v16, %v4407_v32  ;;  %v4564_v27 = vmul.f32 0.0, %v4409_v33 }
 0x186   :  { %v1175_v36 = vmul.f32 %v1001_v21, %v4525_v41  ;;  %v1017_v37 = vrot.slane %v804_v24, %v4419_v50  ;;  %v766_v39 = vcombine.high %v762_v11, %v762_v11  ;;  %v369_v43 = vadd.f32 %v4432_v2, %v4409_v33 }
 0x187   :  { %1228 = vadd.xlane.f32.xlu1 %v1167_v25  ;;  %v764_v25 = vcombine.high %v748_v63, %v748_v63  ;;  %v1178_v44 = vmul.f32 %v1013_v23, %v4546_v22  ;;  %v783_v46 = vcombine.high %v781_v35, %v781_v35  ;;  %v370_v31 = vadd.f32 %v4564_v27, %v4454_v26 }
 0x188   :  { %v1179_v47 = vmul.f32 %v1017_v37, %v4546_v22  ;;  %v1009_v48 = vrot.slane %v766_v39, %v4419_v50  ;;  %v3845_v51 = vpack.c.bf16 %v369_v43, %v369_v43  ;;  %v371_v7 = vadd.f32 %v4564_v27, %v4460_v38 }
 0x189   :  { %1230 = vadd.xlane.f32.xlu0 %v1168_v8  ;;  %v1005_v45 = vrot.slane %v764_v25, %v4419_v50  ;;  %v812_v8 = vcombine.high %v790_v13, %v790_v13  ;;  %v811_v58 = vrot.slane %v783_v46, %v4407_v32  ;;  %v3846_v63 = vpack.c.bf16 %v370_v31, %v370_v31 }
 0x18a   :  { %v1177_v33 = vmul.f32 %v1009_v48, %v4525_v41  ;;  %v4576_v59 = vunpack.c.l.bf16 %v3845_v51  ;;  %v1045_v12 = vrot.slane %v4504_v42, %v4419_v50  ;;  %v861_v13 = vcombine.high %v4504_v42, %v4504_v42 }
 0x18b   :  { %1232 = vadd.xlane.f32.xlu1 %v1169_v54  ;;  %v1176_v2 = vmul.f32 %v1005_v45, %v4525_v41  ;;  %v1021_v53 = vrot.slane %v812_v8, %v4419_v50  ;;  %v797_v54 = vrot.slane %v781_v35, %v4407_v32  ;;  %v1033_v26 = vrot.slane %v811_v58, %v4419_v50 }
 0x18c   :  { %5499 = vst [vmem:[#allocation27_spill] sm:$0xff] %v4576_v59  ;;  %v4584_v6 = vunpack.c.l.bf16 %v3846_v63  ;;  %v863_v38 = vcombine.high %v4528_v3, %v4528_v3  ;;  %v3847_v23 = vpack.c.bf16 %v371_v7, %v371_v7  ;;  %v1053_v25 = vrot.slane %v861_v13, %v4419_v50 }
 0x18d   :  { %1234 = vadd.xlane.f32.xlu0 %v1170_v49  ;;  %v814_v49 = vcombine.high %v804_v24, %v804_v24  ;;  %v1180_v60 = vmul.f32 %v1021_v53, %v4546_v22  ;;  %v813_v55 = vcombine.high %v797_v54, %v797_v54  ;;  %v372_v42 = vadd.f32 %v4449_v20, %v4564_v27 }
 0x18e   :  { %5500 = vst [vmem:[#allocation28_spill] sm:$0xff] %v4584_v6  ;;  %v1186_v24 = vmul.f32 %v1045_v12, %v4584_v6  ;;  %v4606_v37 = vunpack.c.l.bf16 %v3847_v23  ;;  %v1061_v39 = vrot.slane %v4533_v62, %v4419_v50  ;;  %v1065_v45 = vrot.slane %v4536_v5, %v4419_v50 }
 0x18f   :  { %1236 = vadd.xlane.f32.xlu1 %v1171_v61  ;;  %v1025_v1 = vrot.slane %v814_v49, %v4419_v50  ;;  %v1029_v61 = vrot.slane %v797_v54, %v4419_v50  ;;  %v1037_v32 = vrot.slane %v813_v55, %v4419_v50  ;;  %v3848_v43 = vpack.c.bf16 %v372_v42, %v372_v42 }
 0x190   :  { %5501 = vst [vmem:[#allocation29_spill] sm:$0xff] %v4606_v37  ;;  %v1190_v20 = vmul.f32 %v1061_v39, %v4606_v37  ;;  %v1077_v46 = vrot.slane %v4517_v57, %v4419_v50  ;;  %v1191_v48 = vmul.f32 %v1065_v45, %v4606_v37  ;;  %v1081_v49 = vrot.slane %v4542_v14, %v4419_v50 }
 0x191   :  { %1238 = vadd.xlane.f32.xlu0 %v1172_v4  ;;  %v1181_v0 = vmul.f32 %v1025_v1, %v4546_v22  ;;  %v815_v4 = vcombine.high %v811_v58, %v811_v58  ;;  %v1182_v56 = vmul.f32 %v1029_v61, %v4576_v59  ;;  %v1184_v16 = vmul.f32 %v1037_v32, %v4576_v59 }
 0x192   :  { %v4615_v8 = vunpack.c.l.bf16 %v3848_v43  ;;  %v864_v51 = vcombine.high %v4536_v5, %v4536_v5  ;;  %v912_v1 = vcombine.high %v4542_v14, %v4542_v14  ;;  %v1093_v55 = vrot.slane %v4551_v34, %v4419_v50 }
 0x193   :  { %1240 = vadd.xlane.f32.xlu1 %v1173_v10  ;;  %v1183_v10 = vmul.f32 %v1033_v26, %v4576_v59  ;;  %v1041_v11 = vrot.slane %v815_v4, %v4419_v50  ;;  %v911_v14 = vcombine.high %v4551_v34, %v4551_v34  ;;  %v913_v26 = vcombine.high %v4554_v19, %v4554_v19 }
 0x194   :  { %5502 = vst [vmem:[#allocation30_spill] sm:$0xff] %v4615_v8  ;;  %v1194_v53 = vmul.f32 %v1077_v46, %v4615_v8  ;;  %v1195_v31 = vmul.f32 %v1081_v49, %v4615_v8  ;;  %v4906_v9 = vsub.s32 2, %v4402_v30 }
 0x195   :  { %1242 = vadd.xlane.f32.xlu0 %v1174_v18  ;;  %v1049_v18 = vrot.slane %v4528_v3, %v4419_v50  ;;  %v1185_v21 = vmul.f32 %v1041_v11, %v4576_v59  ;;  %v1188_v3 = vmul.f32 %v1053_v25, %v4584_v6  ;;  %v1105_v7 = vrot.slane %v913_v26, %v4419_v50 }
 0x196   :  { %v1347_v11 = vand.u32 127, %v624_v28 }
 0x197   :  { %1244 = vadd.xlane.f32.xlu1 %v1175_v36  ;;  %v1187_v35 = vmul.f32 %v1049_v18, %v4584_v6  ;;  %v1057_v36 = vrot.slane %v863_v38, %v4419_v50 }
 0x198   :  { %v4662_v12 = vsub.s32 %v1347_v11, %v4402_v30 }
 0x199   :  { %1250 = vadd.xlane.f32.xlu0 %v1178_v44  ;;  %v1189_v44 = vmul.f32 %v1057_v36, %v4584_v6 }
 0x19a   :  { %5504 = vst [vmem:[#allocation32_spill] sm:$0xff] %v4662_v12 }
 0x19b   :  { %1252 = vadd.xlane.f32.xlu1 %v1179_v47  ;;  %v862_v47 = vcombine.high %v4533_v62, %v4533_v62  ;;  %v910_v62 = vcombine.high %v4517_v57, %v4517_v57 }
 0x19d   :  { %1246 = vadd.xlane.f32.xlu0 %v1176_v2  ;;  %v373_v2 = vadd.f32 %v4456_v29, %v4564_v27  ;;  %v1069_v54 = vrot.slane %v862_v47, %v4419_v50  ;;  %v1085_v27 = vrot.slane %v910_v62, %v4419_v50 }
 0x19f   :  { %1248 = vadd.xlane.f32.xlu1 %v1177_v33  ;;  %v1073_v33 = vrot.slane %v864_v51, %v4419_v50  ;;  %v3849_v5 = vpack.c.bf16 %v373_v2, %v373_v2  ;;  %v1192_v29 = vmul.f32 %v1069_v54, %v4606_v37  ;;  %v1196_v61 = vmul.f32 %v1085_v27, %v4615_v8 }
 0x1a1   :  { %1254 = vadd.xlane.f32.xlu0 %v1180_v60  ;;  %v1193_v58 = vmul.f32 %v1073_v33, %v4606_v37  ;;  %v1089_v60 = vrot.slane %v912_v1, %v4419_v50  ;;  %v4640_v57 = vunpack.c.l.bf16 %v3849_v5 }
 0x1a3   :  { %1256 = vadd.xlane.f32.xlu1 %v1181_v0  ;;  %5503 = vst [vmem:[#allocation31_spill] sm:$0xff] %v4640_v57  ;;  %v1197_v63 = vmul.f32 %v1089_v60, %v4615_v8  ;;  %v1097_v0 = vrot.slane %v4554_v19, %v4419_v50  ;;  %v1198_v4 = vmul.f32 %v1093_v55, %v4640_v57 }
 0x1a5   :  { %1258 = vadd.xlane.f32.xlu0 %v1182_v56  ;;  %v1101_v56 = vrot.slane %v911_v14, %v4419_v50  ;;  %v1199_v32 = vmul.f32 %v1097_v0, %v4640_v57 }
 0x1a7   :  { %1260 = vadd.xlane.f32.xlu1 %v1183_v10  ;;  %v1200_v34 = vmul.f32 %v1101_v56, %v4640_v57  ;;  %v1201_v10 = vmul.f32 %v1105_v7, %v4640_v57 }
 0x1a9   :  { %1262 = vadd.xlane.f32.xlu0 %v1184_v16 }
 0x1ab   :  { %1264 = vadd.xlane.f32.xlu1 %v1185_v21 }
 0x1ad   :  { %1266 = vadd.xlane.f32.xlu0 %v1186_v24 }
 0x1af   :  { %1268 = vadd.xlane.f32.xlu1 %v1187_v35 }
 0x1b1   :  { %1270 = vadd.xlane.f32.xlu0 %v1188_v3 }
 0x1b3   :  { %1272 = vadd.xlane.f32.xlu1 %v1189_v44 }
 0x1b5   :  { %1274 = vadd.xlane.f32.xlu0 %v1190_v20 }
 0x1b7   :  { %1276 = vadd.xlane.f32.xlu1 %v1191_v48 }
 0x1b9   :  { %1282 = vadd.xlane.f32.xlu0 %v1194_v53 }
 0x1bb   :  { %1284 = vadd.xlane.f32.xlu1 %v1195_v31 }
 0x1bd   :  { %1278 = vadd.xlane.f32.xlu0 %v1192_v29 }
 0x1bf   :  { %1280 = vadd.xlane.f32.xlu1 %v1193_v58 }
 0x1c1   :  { %1286 = vadd.xlane.f32.xlu0 %v1196_v61 }
 0x1c3   :  { %1288 = vadd.xlane.f32.xlu1 %v1197_v63 }
 0x1c5   :  { %1290 = vadd.xlane.f32.xlu0 %v1198_v4 }
 0x1c7   :  { %1292 = vadd.xlane.f32.xlu1 %v1199_v32 }
 0x1c9   :  { %1294 = vadd.xlane.f32.xlu0 %v1200_v34 }
 0x1cb   :  { %1296 = vadd.xlane.f32.xlu1 %v1201_v10 }
 0x1fa   :  { %v4659_v19 = vpop.xlane.xlu0 %1202 }
 0x1fb   :  { %v1351_v18 = vrot.slane %v4659_v19, %v4662_v12 }
 0x1fc   :  { %v4664_v13 = vpop.xlane.xlu1 %1206 }
 0x1fd   :  { %v1359_v28 = vrot.slane %v4664_v13, %v4662_v12 }
 0x1fe   :  { %v4666_v16 = vpop.xlane.xlu0 %1204 }
 0x1ff   :  { %v1355_v38 = vrot.slane %v4666_v16, %v4662_v12 }
 0x200   :  { %v4674_v21 = vpop.xlane.xlu1 %1208 }
 0x201   :  { %v1363_v23 = vrot.slane %v4674_v21, %v4662_v12  ;;  %v1541_v24 = vsel %vm1540_vm1, %v1355_v38, %v1351_v18 }
 0x202   :  { %v4679_v25 = vpop.xlane.xlu0 %1210  ;;  %v1543_v42 = vsel %vm1542_vm2, %v1359_v28, %v1541_v24 }
 0x203   :  { %v1545_v35 = vsel %vm1544_vm3, %v1363_v23, %v1543_v42  ;;  %v1367_v20 = vrot.slane %v4679_v25, %v4662_v12 }
 0x204   :  { %v4683_v36 = vpop.xlane.xlu1 %1212  ;;  %v1592_v3 = vsel %vm1591_vm4, %v1545_v35, -inf }
 0x205   :  { %1593 = vmax.xlane.f32.xlu0 %v1592_v3  ;;  %v1371_v43 = vrot.slane %v4683_v36, %v4662_v12 }
 0x206   :  { %v4686_v39 = vpop.xlane.xlu0 %1218 }
 0x207   :  { %v1546_v49 = vsel %vm1540_vm1, %v1371_v43, %v1367_v20  ;;  %v1383_v53 = vrot.slane %v4686_v39, %v4662_v12 }
 0x208   :  { %v4690_v44 = vpop.xlane.xlu1 %1220 }
 0x209   :  { %v1387_v47 = vrot.slane %v4690_v44, %v4662_v12 }
 0x20a   :  { %v4694_v45 = vpop.xlane.xlu0 %1214 }
 0x20b   :  { %v1375_v46 = vrot.slane %v4694_v45, %v4662_v12  ;;  %v1549_v5 = vsel %vm1540_vm1, %v1387_v47, %v1383_v53 }
 0x20c   :  { %v4700_v48 = vpop.xlane.xlu1 %1216 }
 0x20d   :  { %v1379_v51 = vrot.slane %v4700_v48, %v4662_v12  ;;  %v1547_v2 = vsel %vm1542_vm2, %v1375_v46, %v1546_v49 }
 0x20e   :  { %v4708_v54 = vpop.xlane.xlu0 %1222 }
 0x20f   :  { %v1391_v62 = vrot.slane %v4708_v54, %v4662_v12  ;;  %v1548_v31 = vsel %vm1544_vm3, %v1379_v51, %v1547_v2 }
 0x210   :  { %v4713_v33 = vpop.xlane.xlu1 %1224  ;;  %v1595_v1 = vsel %vm1591_vm4, %v1548_v31, -inf }
 0x211   :  { %v1395_v29 = vrot.slane %v4713_v33, %v4662_v12  ;;  %1596 = vmax.xlane.f32.xlu1 %v1595_v1  ;;  %v1550_v27 = vsel %vm1542_vm2, %v1391_v62, %v1549_v5 }
 0x212   :  { %v4720_v58 = vpop.xlane.xlu0 %1226 }
 0x213   :  { %v1551_v60 = vsel %vm1544_vm3, %v1395_v29, %v1550_v27  ;;  %v1399_v14 = vrot.slane %v4720_v58, %v4662_v12 }
 0x214   :  { %v4723_v61 = vpop.xlane.xlu1 %1228  ;;  %v1598_v55 = vsel %vm1591_vm4, %v1551_v60, -inf  ;;  %v4266_v60 = vmov 0  }
 0x215   :  { %v1403_v63 = vrot.slane %v4723_v61, %v4662_v12  ;;  %1599 = vmax.xlane.f32.xlu0 %v1598_v55  ;;  %3945 = vset.pattern.permute.xlu1 %v4266_v60 }
 0x216   :  { %v4730_v0 = vpop.xlane.xlu0 %1230  ;;  %3944 = vset.pattern.permute.xlu0 %v4266_v60 }
 0x217   :  { %v1407_v26 = vrot.slane %v4730_v0, %v4662_v12  ;;  %v1552_v4 = vsel %vm1540_vm1, %v1403_v63, %v1399_v14 }
 0x218   :  { %v4735_v56 = vpop.xlane.xlu1 %1232 }
 0x219   :  { %v1411_v32 = vrot.slane %v4735_v56, %v4662_v12  ;;  %v1553_v7 = vsel %vm1542_vm2, %v1407_v26, %v1552_v4 }
 0x21a   :  { %v4740_v34 = vpop.xlane.xlu0 %1234 }
 0x21b   :  { %v1415_v10 = vrot.slane %v4740_v34, %v4662_v12  ;;  %v1554_v11 = vsel %vm1544_vm3, %v1411_v32, %v1553_v7 }
 0x21c   :  { %v4745_v18 = vpop.xlane.xlu1 %1236  ;;  %v1601_v38 = vsel %vm1591_vm4, %v1554_v11, -inf }
 0x21d   :  { %v1419_v28 = vrot.slane %v4745_v18, %v4662_v12  ;;  %1602 = vmax.xlane.f32.xlu1 %v1601_v38 }
 0x21e   :  { %v4750_v23 = vpop.xlane.xlu0 %1238 }
 0x21f   :  { %v1423_v24 = vrot.slane %v4750_v23, %v4662_v12  ;;  %v1555_v42 = vsel %vm1540_vm1, %v1419_v28, %v1415_v10 }
 0x220   :  { %v4755_v35 = vpop.xlane.xlu1 %1240 }
 0x221   :  { %v1427_v3 = vrot.slane %v4755_v35, %v4662_v12  ;;  %v1556_v43 = vsel %vm1542_vm2, %v1423_v24, %v1555_v42 }
 0x222   :  { %v4760_v20 = vpop.xlane.xlu0 %1242 }
 0x223   :  { %v1557_v46 = vsel %vm1544_vm3, %v1427_v3, %v1556_v43  ;;  %v1431_v62 = vrot.slane %v4760_v20, %v4662_v12 }
 0x224   :  { %v4763_v47 = vpop.xlane.xlu1 %1244  ;;  %v1604_v49 = vsel %vm1591_vm4, %v1557_v46, -inf }
 0x225   :  { %1605 = vmax.xlane.f32.xlu0 %v1604_v49  ;;  %v1435_v2 = vrot.slane %v4763_v47, %v4662_v12 }
 0x226   :  { %v4766_v51 = vpop.xlane.xlu0 %1250 }
 0x227   :  { %v1558_v27 = vsel %vm1540_vm1, %v1435_v2, %v1431_v62  ;;  %v1447_v63 = vrot.slane %v4766_v51, %v4662_v12 }
 0x228   :  { %v4770_v53 = vpop.xlane.xlu1 %1252 }
 0x229   :  { %v1451_v5 = vrot.slane %v4770_v53, %v4662_v12 }
 0x22a   :  { %v4774_v31 = vpop.xlane.xlu0 %1246 }
 0x22b   :  { %v1439_v1 = vrot.slane %v4774_v31, %v4662_v12  ;;  %v1561_v11 = vsel %vm1540_vm1, %v1451_v5, %v1447_v63 }
 0x22c   :  { %v4780_v29 = vpop.xlane.xlu1 %1248 }
 0x22d   :  { %v1443_v55 = vrot.slane %v4780_v29, %v4662_v12  ;;  %v1559_v14 = vsel %vm1542_vm2, %v1439_v1, %v1558_v27 }
 0x22e   :  { %v4788_v26 = vpop.xlane.xlu0 %1254 }
 0x22f   :  { %v1455_v4 = vrot.slane %v4788_v26, %v4662_v12  ;;  %v1560_v32 = vsel %vm1544_vm3, %v1443_v55, %v1559_v14 }
 0x230   :  { %v4793_v7 = vpop.xlane.xlu1 %1256  ;;  %v1607_v10 = vsel %vm1591_vm4, %v1560_v32, -inf }
 0x231   :  { %v1459_v38 = vrot.slane %v4793_v7, %v4662_v12  ;;  %1608 = vmax.xlane.f32.xlu1 %v1607_v10  ;;  %v1562_v28 = vsel %vm1542_vm2, %v1455_v4, %v1561_v11 }
 0x232   :  { %v4800_v24 = vpop.xlane.xlu0 %1258 }
 0x233   :  { %v1563_v42 = vsel %vm1544_vm3, %v1459_v38, %v1562_v28  ;;  %v1463_v46 = vrot.slane %v4800_v24, %v4662_v12 }
 0x234   :  { %v4803_v3 = vpop.xlane.xlu1 %1260  ;;  %v1610_v43 = vsel %vm1591_vm4, %v1563_v42, -inf }
 0x235   :  { %v1467_v49 = vrot.slane %v4803_v3, %v4662_v12  ;;  %1611 = vmax.xlane.f32.xlu0 %v1610_v43 }
 0x236   :  { %v4810_v2 = vpop.xlane.xlu0 %1262 }
 0x237   :  { %v1471_v62 = vrot.slane %v4810_v2, %v4662_v12  ;;  %v1564_v1 = vsel %vm1540_vm1, %v1467_v49, %v1463_v46 }
 0x238   :  { %v4815_v5 = vpop.xlane.xlu1 %1264 }
 0x239   :  { %v1475_v27 = vrot.slane %v4815_v5, %v4662_v12  ;;  %v1565_v60 = vsel %vm1542_vm2, %v1471_v62, %v1564_v1 }
 0x23a   :  { %v4820_v55 = vpop.xlane.xlu0 %1266 }
 0x23b   :  { %v1479_v14 = vrot.slane %v4820_v55, %v4662_v12  ;;  %v1566_v63 = vsel %vm1544_vm3, %v1475_v27, %v1565_v60 }
 0x23c   :  { %v4825_v4 = vpop.xlane.xlu1 %1268  ;;  %v1613_v32 = vsel %vm1591_vm4, %v1566_v63, -inf }
 0x23d   :  { %v1483_v10 = vrot.slane %v4825_v4, %v4662_v12  ;;  %1614 = vmax.xlane.f32.xlu1 %v1613_v32 }
 0x23e   :  { %v4830_v11 = vpop.xlane.xlu0 %1270 }
 0x23f   :  { %v1487_v38 = vrot.slane %v4830_v11, %v4662_v12  ;;  %v1567_v28 = vsel %vm1540_vm1, %v1483_v10, %v1479_v14 }
 0x240   :  { %v4835_v42 = vpop.xlane.xlu1 %1272 }
 0x241   :  { %v1491_v43 = vrot.slane %v4835_v42, %v4662_v12  ;;  %v1568_v46 = vsel %vm1542_vm2, %v1487_v38, %v1567_v28 }
 0x242   :  { %v4840_v49 = vpop.xlane.xlu0 %1274 }
 0x243   :  { %v1569_v62 = vsel %vm1544_vm3, %v1491_v43, %v1568_v46  ;;  %v1495_v32 = vrot.slane %v4840_v49, %v4662_v12 }
 0x244   :  { %v4843_v1 = vpop.xlane.xlu1 %1276  ;;  %v1616_v27 = vsel %vm1591_vm4, %v1569_v62, -inf }
 0x245   :  { %1617 = vmax.xlane.f32.xlu0 %v1616_v27  ;;  %v1499_v14 = vrot.slane %v4843_v1, %v4662_v12 }
 0x246   :  { %v4846_v60 = vpop.xlane.xlu0 %1282 }
 0x247   :  { %v1570_v46 = vsel %vm1540_vm1, %v1499_v14, %v1495_v32  ;;  %v1511_v57 = vrot.slane %v4846_v60, %v4662_v12 }
 0x248   :  { %v4850_v63 = vpop.xlane.xlu1 %1284 }
 0x249   :  { %v1515_v28 = vrot.slane %v4850_v63, %v4662_v12 }
 0x24a   :  { %v4854_v10 = vpop.xlane.xlu0 %1278 }
 0x24b   :  { %v1503_v38 = vrot.slane %v4854_v10, %v4662_v12  ;;  %v1573_v14 = vsel %vm1540_vm1, %v1515_v28, %v1511_v57 }
 0x24c   :  { %v4860_v43 = vpop.xlane.xlu1 %1280 }
 0x24d   :  { %v1507_v62 = vrot.slane %v4860_v43, %v4662_v12  ;;  %v1571_v27 = vsel %vm1542_vm2, %v1503_v38, %v1570_v46 }
 0x24e   :  { %v4868_v37 = vpop.xlane.xlu0 %1286 }
 0x24f   :  { %5505 = vst [vmem:[#allocation33_spill] sm:$0xff] %v4868_v37  ;;  %v1519_v8 = vrot.slane %v4868_v37, %v4662_v12  ;;  %v1572_v6 = vsel %vm1544_vm3, %v1507_v62, %v1571_v27 }
 0x250   :  { %v4873_v59 = vpop.xlane.xlu1 %1288  ;;  %v1619_v22 = vsel %vm1591_vm4, %v1572_v6, -inf }
 0x251   :  { %v1523_v32 = vrot.slane %v4873_v59, %v4662_v12  ;;  %1620 = vmax.xlane.f32.xlu1 %v1619_v22  ;;  %v1574_v38 = vsel %vm1542_vm2, %v1519_v8, %v1573_v14 }
 0x252   :  { %v4880_v46 = vpop.xlane.xlu0 %1290 }
 0x253   :  { %5506 = vst [vmem:[#allocation34_spill] sm:$0xff] %v4880_v46  ;;  %v1575_v41 = vsel %vm1544_vm3, %v1523_v32, %v1574_v38  ;;  %v1527_v27 = vrot.slane %v4880_v46, %v4662_v12 }
 0x254   :  { %v4883_v17 = vpop.xlane.xlu1 %1292  ;;  %v1622_v62 = vsel %vm1591_vm4, %v1575_v41, -inf }
 0x255   :  { %v1531_v6 = vrot.slane %v4883_v17, %v4662_v12  ;;  %1623 = vmax.xlane.f32.xlu0 %v1622_v62  ;;  %v4903_v62 = vsub.s32 1, %v4402_v30 }
 0x256   :  { %v4890_v57 = vpop.xlane.xlu0 %1294 }
 0x257   :  { %5507 = vst [vmem:[#allocation35_spill] sm:$0xff] %v4890_v57  ;;  %v1535_v22 = vrot.slane %v4890_v57, %v4662_v12  ;;  %v1576_v8 = vsel %vm1540_vm1, %v1531_v6, %v1527_v27  ;;  %v4909_v27 = vsub.s32 3, %v4402_v30 }
 0x258   :  { %v4895_v28 = vpop.xlane.xlu1 %1296 }
 0x259   :  { %v1539_v14 = vrot.slane %v4895_v28, %v4662_v12  ;;  %v1577_v41 = vsel %vm1542_vm2, %v1535_v22, %v1576_v8 }
 0x25b   :  { %v1578_v32 = vsel %vm1544_vm3, %v1539_v14, %v1577_v41 }
 0x25c   :  { %v1625_v38 = vsel %vm1591_vm4, %v1578_v32, -inf }
 0x25d   :  { %1626 = vmax.xlane.f32.xlu1 %v1625_v38 }
 0x292   :  { %v1594_v6 = vpop.xlane.xlu0 %1593 }
 0x293   :  { %v1643_v40 = vrot.slane %v1594_v6, %v4419_v50  ;;  %v1647_v15 = vrot.slane %v1594_v6, %v4903_v62  ;;  %v1651_v22 = vrot.slane %v1594_v6, %v4906_v9  ;;  %v1655_v41 = vrot.slane %v1594_v6, %v4909_v27 }
 0x295   :  { %v1880_v8 = vsub.f32 %v4659_v19, %v1643_v40  ;;  %v1881_v14 = vsub.f32 %v4666_v16, %v1647_v15  ;;  %v1882_v32 = vsub.f32 %v4664_v13, %v1651_v22  ;;  %v1883_v30 = vsub.f32 %v4674_v21, %v1655_v41 }
 0x297   :  { %v1928_v38 = vmul.f32 1.442695, %v1880_v8  ;;  %v1930_v52 = vmul.f32 1.442695, %v1881_v14  ;;  %v1932_v12 = vmul.f32 1.442695, %v1882_v32 }
 0x298   :  { %v1934_v57 = vmul.f32 1.442695, %v1883_v30 }
 0x299   :  { %3971 = vpow2.f32 %v1928_v38 }
 0x29a   :  { %3973 = vpow2.f32 %v1930_v52 }
 0x29b   :  { %3975 = vpow2.f32 %v1932_v12 }
 0x29c   :  { %3977 = vpow2.f32 %v1934_v57 }
 0x29e   :  { %v1597_v46 = vpop.xlane.xlu1 %1596 }
 0x29f   :  { %v1659_v37 = vrot.slane %v1597_v46, %v4419_v50  ;;  %v1663_v40 = vrot.slane %v1597_v46, %v4903_v62  ;;  %v1667_v15 = vrot.slane %v1597_v46, %v4906_v9  ;;  %v1671_v8 = vrot.slane %v1597_v46, %v4909_v27 }
 0x2a1   :  { %v1884_v19 = vsub.f32 %v4679_v25, %v1659_v37  ;;  %v1885_v13 = vsub.f32 %v4683_v36, %v1663_v40  ;;  %v1886_v14 = vsub.f32 %v4694_v45, %v1667_v15  ;;  %v1887_v32 = vsub.f32 %v4700_v48, %v1671_v8 }
 0x2a2   :  { %v1600_v16 = vpop.xlane.xlu0 %1599 }
 0x2a3   :  { %v4924_v6 = vpop.eup %3971  ;;  %v1936_v21 = vmul.f32 1.442695, %v1884_v19  ;;  %v1679_v12 = vrot.slane %v1600_v16, %v4903_v62  ;;  %v1687_v22 = vrot.slane %v1600_v16, %v4909_v27  ;;  %v1938_v37 = vmul.f32 1.442695, %v1885_v13 }
 0x2a4   :  { %v4926_v52 = vpop.eup %3973  ;;  %2073 = vperm.xlu0 %3944, %v4924_v6   ;;  %v1940_v38 = vmul.f32 1.442695, %v1886_v14  ;;  %v1675_v30 = vrot.slane %v1600_v16, %v4419_v50 }
 0x2a5   :  { %3979 = vpow2.f32 %v1936_v21  ;;  %2076 = vperm.xlu1 %3945, %v4926_v52   ;;  %v1889_v25 = vsub.f32 %v4690_v44, %v1679_v12  ;;  %v1891_v36 = vsub.f32 %v4713_v33, %v1687_v22  ;;  %v4936_v57 = vpop.eup %3975  ;;  %v1942_v33 = vmul.f32 1.442695, %v1887_v32 }
 0x2a6   :  { %3981 = vpow2.f32 %v1938_v37  ;;  %v4942_v15 = vpop.eup %3977  ;;  %v1683_v21 = vrot.slane %v1600_v16, %v4906_v9  ;;  %v1888_v12 = vsub.f32 %v4686_v39, %v1675_v30 }
 0x2a7   :  { %v1946_v41 = vmul.f32 1.442695, %v1889_v25  ;;  %v1950_v46 = vmul.f32 1.442695, %v1891_v36 }
 0x2a8   :  { %v1944_v25 = vmul.f32 1.442695, %v1888_v12 }
 0x2a9   :  { %2079 = vperm.xlu1 %3945, %v4936_v57   ;;  %3983 = vpow2.f32 %v1946_v41 }
 0x2aa   :  { %v1603_v45 = vpop.xlane.xlu1 %1602  ;;  %3985 = vpow2.f32 %v1940_v38 }
 0x2ab   :  { %v1695_v40 = vrot.slane %v1603_v45, %v4903_v62  ;;  %v1703_v44 = vrot.slane %v1603_v45, %v4909_v27  ;;  %3987 = vpow2.f32 %v1950_v46  ;;  %v1699_v32 = vrot.slane %v1603_v45, %v4906_v9 }
 0x2ac   :  { %3989 = vpow2.f32 %v1942_v33 }
 0x2ad   :  { %v1893_v19 = vsub.f32 %v4723_v61, %v1695_v40  ;;  %2082 = vperm.xlu1 %3945, %v4942_v15   ;;  %v1895_v48 = vsub.f32 %v4735_v56, %v1703_v44  ;;  %v1890_v61 = vsub.f32 %v4708_v54, %v1683_v21  ;;  %v1691_v56 = vrot.slane %v1603_v45, %v4419_v50 }
 0x2af   :  { %v4948_v13 = vpop.eup %3979  ;;  %v1954_v22 = vmul.f32 1.442695, %v1893_v19  ;;  %v1958_v8 = vmul.f32 1.442695, %v1895_v48  ;;  %v1948_v46 = vmul.f32 1.442695, %v1890_v61  ;;  %v1892_v30 = vsub.f32 %v4720_v58, %v1691_v56 }
 0x2b0   :  { %v4953_v37 = vpop.eup %3981 }
 0x2b1   :  { %2085 = vperm.xlu1 %3945, %v4948_v13   ;;  %3991 = vpow2.f32 %v1954_v22 }
 0x2b2   :  { %v1606_v14 = vpop.xlane.xlu0 %1605  ;;  %3993 = vpow2.f32 %v1958_v8 }
 0x2b3   :  { %v1711_v36 = vrot.slane %v1606_v14, %v4903_v62  ;;  %v4958_v41 = vpop.eup %3983  ;;  %v1719_v39 = vrot.slane %v1606_v14, %v4909_v27  ;;  %3995 = vpow2.f32 %v1944_v25  ;;  %v1707_v19 = vrot.slane %v1606_v14, %v4419_v50 }
 0x2b4   :  { %2100 = vperm.xlu0 %3944, %v4958_v41   ;;  %v4966_v38 = vpop.eup %3985  ;;  %v1715_v58 = vrot.slane %v1606_v14, %v4906_v9 }
 0x2b5   :  { %v1897_v16 = vsub.f32 %v4745_v18, %v1711_v36  ;;  %2088 = vperm.xlu1 %3945, %v4953_v37   ;;  %v1899_v54 = vsub.f32 %v4755_v35, %v1719_v39  ;;  %v4969_v44 = vpop.eup %3987  ;;  %v1894_v18 = vsub.f32 %v4730_v0, %v1699_v32  ;;  %v1952_v35 = vmul.f32 1.442695, %v1892_v30 }
 0x2b6   :  { %v4974_v33 = vpop.eup %3989  ;;  %v1896_v0 = vsub.f32 %v4740_v34, %v1707_v19  ;;  %v1898_v14 = vsub.f32 %v4750_v23, %v1715_v58 }
 0x2b7   :  { %v1962_v40 = vmul.f32 1.442695, %v1897_v16  ;;  %v1966_v45 = vmul.f32 1.442695, %v1899_v54  ;;  %v1956_v21 = vmul.f32 1.442695, %v1894_v18 }
 0x2b8   :  { %2106 = vperm.xlu0 %3944, %v4969_v44   ;;  %v1960_v34 = vmul.f32 1.442695, %v1896_v0  ;;  %v1964_v23 = vmul.f32 1.442695, %v1898_v14 }
 0x2b9   :  { %2091 = vperm.xlu1 %3945, %v4966_v38   ;;  %3997 = vpow2.f32 %v1962_v40 }
 0x2ba   :  { %3999 = vpow2.f32 %v1948_v46 }
 0x2bb   :  { %v4977_v48 = vpop.eup %3991  ;;  %4001 = vpow2.f32 %v1966_v45 }
 0x2bc   :  { %2112 = vperm.xlu0 %3944, %v4977_v48   ;;  %4003 = vpow2.f32 %v1952_v35  ;;  %v4985_v61 = vpop.eup %3993 }
 0x2bd   :  { %2094 = vperm.xlu1 %3945, %v4974_v33   ;;  %v4987_v25 = vpop.eup %3995  ;;  %4005 = vpow2.f32 %v1956_v21 }
 0x2be   :  { %v1609_v12 = vpop.xlane.xlu1 %1608 }
 0x2bf   :  { %v1727_v22 = vrot.slane %v1609_v12, %v4903_v62  ;;  %v1735_v8 = vrot.slane %v1609_v12, %v4909_v27  ;;  %v1723_v16 = vrot.slane %v1609_v12, %v4419_v50  ;;  %v1731_v18 = vrot.slane %v1609_v12, %v4906_v9 }
 0x2c0   :  { %2118 = vperm.xlu0 %3944, %v4985_v61  }
 0x2c1   :  { %v1901_v56 = vsub.f32 %v4763_v47, %v1727_v22  ;;  %v1903_v36 = vsub.f32 %v4780_v29, %v1735_v8  ;;  %2097 = vperm.xlu1 %3945, %v4987_v25   ;;  %v1900_v45 = vsub.f32 %v4760_v20, %v1723_v16  ;;  %v1902_v0 = vsub.f32 %v4774_v31, %v1731_v18 }
 0x2c2   :  { %v1612_v39 = vpop.xlane.xlu0 %1611 }
 0x2c3   :  { %v1970_v32 = vmul.f32 1.442695, %v1901_v56  ;;  %v4995_v54 = vpop.eup %3997  ;;  %v1743_v46 = vrot.slane %v1612_v39, %v4903_v62  ;;  %v1974_v47 = vmul.f32 1.442695, %v1903_v36  ;;  %v1751_v29 = vrot.slane %v1612_v39, %v4909_v27 }
 0x2c4   :  { %v4998_v30 = vpop.eup %3999  ;;  %2124 = vperm.xlu0 %3944, %v4995_v54   ;;  %v1968_v22 = vmul.f32 1.442695, %v1900_v45  ;;  %v1739_v12 = vrot.slane %v1612_v39, %v4419_v50  ;;  %v1747_v14 = vrot.slane %v1612_v39, %v4906_v9 }
 0x2c5   :  { %4007 = vpow2.f32 %v1970_v32  ;;  %v1905_v40 = vsub.f32 %v4770_v53, %v1743_v46  ;;  %2103 = vperm.xlu1 %3945, %v4998_v30   ;;  %v5006_v35 = vpop.eup %4001  ;;  %v1907_v58 = vsub.f32 %v4793_v7, %v1751_v29 }
 0x2c6   :  { %4009 = vpow2.f32 %v1960_v34  ;;  %v5008_v19 = vpop.eup %4003  ;;  %v1972_v34 = vmul.f32 1.442695, %v1902_v0  ;;  %v1904_v31 = vsub.f32 %v4766_v51, %v1739_v12  ;;  %v1906_v39 = vsub.f32 %v4788_v26, %v1747_v14 }
 0x2c7   :  { %4011 = vpow2.f32 %v1964_v23  ;;  %v1978_v21 = vmul.f32 1.442695, %v1905_v40  ;;  %v5016_v8 = vpop.eup %4005  ;;  %v1982_v56 = vmul.f32 1.442695, %v1907_v58 }
 0x2c8   :  { %2130 = vperm.xlu0 %3944, %v5006_v35   ;;  %4013 = vpow2.f32 %v1974_v47  ;;  %v1976_v29 = vmul.f32 1.442695, %v1904_v31 }
 0x2c9   :  { %2109 = vperm.xlu1 %3945, %v5008_v19   ;;  %4015 = vpow2.f32 %v1978_v21  ;;  %v1980_v21 = vmul.f32 1.442695, %v1906_v39 }
 0x2ca   :  { %v1615_v53 = vpop.xlane.xlu1 %1614  ;;  %4017 = vpow2.f32 %v1968_v22 }
 0x2cb   :  { %v1759_v20 = vrot.slane %v1615_v53, %v4903_v62  ;;  %v1767_v36 = vrot.slane %v1615_v53, %v4909_v27  ;;  %4019 = vpow2.f32 %v1982_v56  ;;  %v1755_v51 = vrot.slane %v1615_v53, %v4419_v50 }
 0x2cc   :  { %4021 = vpow2.f32 %v1972_v34  ;;  %v1763_v45 = vrot.slane %v1615_v53, %v4906_v9 }
 0x2cd   :  { %v1909_v7 = vsub.f32 %v4803_v3, %v1759_v20  ;;  %2115 = vperm.xlu1 %3945, %v5016_v8   ;;  %v1911_v46 = vsub.f32 %v4815_v5, %v1767_v36  ;;  %v1908_v0 = vsub.f32 %v4800_v24, %v1755_v51 }
 0x2ce   :  { %v1910_v53 = vsub.f32 %v4810_v2, %v1763_v45 }
 0x2cf   :  { %v5023_v16 = vpop.eup %4007  ;;  %v1986_v23 = vmul.f32 1.442695, %v1909_v7  ;;  %v1990_v26 = vmul.f32 1.442695, %v1911_v46 }
 0x2d0   :  { %v5025_v32 = vpop.eup %4009  ;;  %2136 = vperm.xlu0 %3944, %v5023_v16   ;;  %v1988_v34 = vmul.f32 1.442695, %v1910_v53 }
 0x2d1   :  { %2121 = vperm.xlu1 %3945, %v5025_v32   ;;  %v5031_v47 = vpop.eup %4011  ;;  %4023 = vpow2.f32 %v1986_v23 }
 0x2d2   :  { %v1618_v3 = vpop.xlane.xlu0 %1617  ;;  %v5035_v18 = vpop.eup %4013  ;;  %4025 = vpow2.f32 %v1976_v29 }
 0x2d3   :  { %v1775_v40 = vrot.slane %v1618_v3, %v4903_v62  ;;  %v1783_v5 = vrot.slane %v1618_v3, %v4909_v27  ;;  %v5043_v22 = vpop.eup %4015  ;;  %4027 = vpow2.f32 %v1990_v26  ;;  %v1771_v56 = vrot.slane %v1618_v3, %v4419_v50 }
 0x2d4   :  { %2142 = vperm.xlu0 %3944, %v5035_v18   ;;  %v5045_v12 = vpop.eup %4017  ;;  %4029 = vpow2.f32 %v1980_v21  ;;  %v1779_v7 = vrot.slane %v1618_v3, %v4906_v9 }
 0x2d5   :  { %v1913_v58 = vsub.f32 %v4825_v4, %v1775_v40  ;;  %2127 = vperm.xlu1 %3945, %v5031_v47   ;;  %v1915_v20 = vsub.f32 %v4835_v42, %v1783_v5  ;;  %v1984_v4 = vmul.f32 1.442695, %v1908_v0  ;;  %v5052_v36 = vpop.eup %4019  ;;  %v1912_v31 = vsub.f32 %v4820_v55, %v1771_v56 }
 0x2d6   :  { %v5054_v24 = vpop.eup %4021  ;;  %v1914_v3 = vsub.f32 %v4830_v11, %v1779_v7 }
 0x2d7   :  { %v1994_v14 = vmul.f32 1.442695, %v1913_v58  ;;  %v1998_v2 = vmul.f32 1.442695, %v1915_v20  ;;  %v1992_v45 = vmul.f32 1.442695, %v1912_v31 }
 0x2d8   :  { %2148 = vperm.xlu0 %3944, %v5043_v22  }
 0x2d9   :  { %2133 = vperm.xlu1 %3945, %v5045_v12   ;;  %4031 = vpow2.f32 %v1994_v14 }
 0x2da   :  { %4033 = vpow2.f32 %v1984_v4 }
 0x2db   :  { %v5062_v23 = vpop.eup %4023  ;;  %4035 = vpow2.f32 %v1998_v2 }
 0x2dc   :  { %2154 = vperm.xlu0 %3944, %v5052_v36   ;;  %v5064_v29 = vpop.eup %4025  ;;  %4037 = vpow2.f32 %v1988_v34 }
 0x2dd   :  { %2139 = vperm.xlu1 %3945, %v5054_v24   ;;  %v5072_v58 = vpop.eup %4027 }
 0x2de   :  { %v1621_v42 = vpop.xlane.xlu1 %1620  ;;  %v5075_v11 = vpop.eup %4029 }
 0x2df   :  { %v1791_v39 = vrot.slane %v1621_v42, %v4903_v62  ;;  %v1799_v46 = vrot.slane %v1621_v42, %v4909_v27  ;;  %v1787_v26 = vrot.slane %v1621_v42, %v4419_v50  ;;  %v1795_v20 = vrot.slane %v1621_v42, %v4906_v9 }
 0x2e0   :  { %2160 = vperm.xlu0 %3944, %v5062_v23  }
 0x2e1   :  { %v1917_v51 = vsub.f32 %v4843_v1, %v1791_v39  ;;  %v1919_v40 = vsub.f32 %v4860_v43, %v1799_v46  ;;  %2145 = vperm.xlu1 %3945, %v5064_v29   ;;  %v1996_v1 = vmul.f32 1.442695, %v1914_v3  ;;  %v1916_v14 = vsub.f32 %v4840_v49, %v1787_v26 }
 0x2e2   :  { %v1624_v55 = vpop.xlane.xlu0 %1623  ;;  %v1918_v2 = vsub.f32 %v4854_v10, %v1795_v20 }
 0x2e3   :  { %v2002_v5 = vmul.f32 1.442695, %v1917_v51  ;;  %v1807_v21 = vrot.slane %v1624_v55, %v4903_v62  ;;  %v2006_v0 = vmul.f32 1.442695, %v1919_v40  ;;  %v1815_v43 = vrot.slane %v1624_v55, %v4909_v27  ;;  %v5083_v4 = vpop.eup %4031 }
 0x2e4   :  { %2166 = vperm.xlu0 %3944, %v5072_v58   ;;  %v5085_v56 = vpop.eup %4033  ;;  %v2000_v31 = vmul.f32 1.442695, %v1916_v14  ;;  %v1803_v42 = vrot.slane %v1624_v55, %v4419_v50  ;;  %v2004_v10 = vmul.f32 1.442695, %v1918_v2  ;;  %v1811_v40 = vrot.slane %v1624_v55, %v4906_v9 }
 0x2e5   :  { %4039 = vpow2.f32 %v2002_v5  ;;  %v1921_v53 = vsub.f32 %v4850_v63, %v1807_v21  ;;  %2151 = vperm.xlu1 %3945, %v5075_v11   ;;  %v1923_v7 = vsub.f32 %v4873_v59, %v1815_v43  ;;  %v5093_v39 = vpop.eup %4035 }
 0x2e6   :  { %4041 = vpow2.f32 %v1992_v45  ;;  %v5095_v46 = vpop.eup %4037  ;;  %v1920_v45 = vsub.f32 %v4846_v60, %v1803_v42  ;;  %v5513_v42 = vld [vmem:[#allocation35_spill] sm:$0xff] }
 0x2e7   :  { %4043 = vpow2.f32 %v1996_v1  ;;  %v2010_v34 = vmul.f32 1.442695, %v1921_v53  ;;  %v2014_v3 = vmul.f32 1.442695, %v1923_v7  ;;  %v5511_v7 = vld [vmem:[#allocation34_spill] sm:$0xff] }
 0x2e8   :  { %2172 = vperm.xlu0 %3944, %v5083_v4   ;;  %4045 = vpow2.f32 %v2006_v0  ;;  %v5509_v0 = vld [vmem:[#allocation33_spill] sm:$0xff]  ;;  %v2008_v55 = vmul.f32 1.442695, %v1920_v45 }
 0x2e9   :  { %2157 = vperm.xlu1 %3945, %v5085_v56   ;;  %4047 = vpow2.f32 %v2010_v34  ;;  %v1922_v43 = vsub.f32 %v5509_v0, %v1811_v40 }
 0x2ea   :  { %v1627_v63 = vpop.xlane.xlu1 %1626  ;;  %4049 = vpow2.f32 %v2000_v31 }
 0x2eb   :  { %v1823_v49 = vrot.slane %v1627_v63, %v4903_v62  ;;  %v1831_v59 = vrot.slane %v1627_v63, %v4909_v27  ;;  %4051 = vpow2.f32 %v2014_v3  ;;  %v1819_v60 = vrot.slane %v1627_v63, %v4419_v50 }
 0x2ec   :  { %2178 = vperm.xlu0 %3944, %v5093_v39   ;;  %4053 = vpow2.f32 %v2004_v10  ;;  %v1827_v14 = vrot.slane %v1627_v63, %v4906_v9 }
 0x2ed   :  { %v1925_v51 = vsub.f32 %v4883_v17, %v1823_v49  ;;  %2163 = vperm.xlu1 %3945, %v5095_v46   ;;  %v1927_v21 = vsub.f32 %v4895_v28, %v1831_v59  ;;  %v2012_v28 = vmul.f32 1.442695, %v1922_v43  ;;  %v1924_v34 = vsub.f32 %v5511_v7, %v1819_v60 }
 0x2ee   :  { %v1926_v49 = vsub.f32 %v5513_v42, %v1827_v14 }
 0x2ef   :  { %v5103_v26 = vpop.eup %4039  ;;  %v2018_v1 = vmul.f32 1.442695, %v1925_v51  ;;  %v2022_v20 = vmul.f32 1.442695, %v1927_v21  ;;  %v2016_v3 = vmul.f32 1.442695, %v1924_v34 }
 0x2f0   :  { %5508 = vst [vmem:[#allocation36_spill] sm:$0xff] %v5103_v26  ;;  %v5105_v5 = vpop.eup %4041  ;;  %2184 = vperm.xlu0 %3944, %v5103_v26   ;;  %v2020_v63 = vmul.f32 1.442695, %v1926_v49 }
 0x2f1   :  { %2169 = vperm.xlu1 %3945, %v5105_v5   ;;  %v5110_v17 = vpop.eup %4043  ;;  %4055 = vpow2.f32 %v2018_v1 }
 0x2f2   :  { %v5114_v53 = vpop.eup %4045  ;;  %4057 = vpow2.f32 %v2008_v55 }
 0x2f3   :  { %5510 = vst [vmem:[#allocation33_spill] sm:$0xff] %v5114_v53  ;;  %v5120_v2 = vpop.eup %4047  ;;  %4059 = vpow2.f32 %v2022_v20  ;;  %v5519_v20 = vld [vmem:[#allocation32_spill] sm:$0xff] }
 0x2f4   :  { %2190 = vperm.xlu0 %3944, %v5114_v53   ;;  %v5122_v31 = vpop.eup %4049  ;;  %4061 = vpow2.f32 %v2012_v28 }
 0x2f5   :  { %2175 = vperm.xlu1 %3945, %v5110_v17   ;;  %5512 = vst [vmem:[#allocation34_spill] sm:$0xff] %v5122_v31  ;;  %v5127_v59 = vpop.eup %4051  ;;  %4063 = vpow2.f32 %v2016_v3 }
 0x2f6   :  { %v5129_v51 = vpop.eup %4053  ;;  %4065 = vpow2.f32 %v2020_v63 }
 0x2f7   :  { %5514 = vst [vmem:[#allocation35_spill] sm:$0xff] %v5129_v51 }
 0x2f8   :  { %2196 = vperm.xlu0 %3944, %v5120_v2  }
 0x2f9   :  { %2181 = vperm.xlu1 %3945, %v5122_v31  }
 0x2fb   :  { %v5133_v10 = vpop.eup %4055 }
 0x2fc   :  { %2202 = vperm.xlu0 %3944, %v5127_v59   ;;  %5515 = vst [vmem:[#allocation37_spill] sm:$0xff] %v5133_v10  ;;  %v5135_v40 = vpop.eup %4057 }
 0x2fd   :  { %2187 = vperm.xlu1 %3945, %v5129_v51   ;;  %v5139_v45 = vpop.eup %4059 }
 0x2fe   :  { %5516 = vst [vmem:[#allocation38_spill] sm:$0xff] %v5139_v45  ;;  %v5141_v21 = vpop.eup %4061 }
 0x2ff   :  { %v5145_v1 = vpop.eup %4063 }
 0x300   :  { %2208 = vperm.xlu0 %3944, %v5133_v10   ;;  %5517 = vst [vmem:[#allocation39_spill] sm:$0xff] %v5145_v1  ;;  %v5148_v0 = vpop.eup %4065 }
 0x301   :  { %2193 = vperm.xlu1 %3945, %v5135_v40   ;;  %5518 = vst [vmem:[#allocation40_spill] sm:$0xff] %v5148_v0 }
 0x304   :  { %2214 = vperm.xlu0 %3944, %v5139_v45  }
 0x305   :  { %2199 = vperm.xlu1 %3945, %v5141_v21  }
 0x309   :  { %2205 = vperm.xlu1 %3945, %v5145_v1  }
 0x30d   :  { %2211 = vperm.xlu1 %3945, %v5148_v0  }
 0x323   :  { %v2074_v55 = vpop.permute.xlu0 %2073 }
 0x324   :  { %v2077_v43 = vpop.permute.xlu1 %2076  ;;  %v2219_v14 = vrot.slane %v2074_v55, %v5519_v20 }
 0x325   :  { %v2223_v28 = vrot.slane %v2077_v43, %v5519_v20 }
 0x327   :  { %v2408_v42 = vsel %vm1540_vm1, %v2223_v28, %v2219_v14 }
 0x328   :  { %v2080_v60 = vpop.permute.xlu1 %2079 }
 0x329   :  { %v2227_v7 = vrot.slane %v2080_v60, %v5519_v20 }
 0x32b   :  { %v2409_v3 = vsel %vm1542_vm2, %v2227_v7, %v2408_v42 }
 0x32c   :  { %v2083_v34 = vpop.permute.xlu1 %2082 }
 0x32d   :  { %v2231_v49 = vrot.slane %v2083_v34, %v5519_v20 }
 0x32f   :  { %v2410_v63 = vsel %vm1544_vm3, %v2231_v49, %v2409_v3 }
 0x330   :  { %v2086_v53 = vpop.permute.xlu1 %2085  ;;  %v2456_v45 = vsel %vm1591_vm4, %v2410_v63, 0.0 }
 0x331   :  { %2457 = vadd.xlane.f32.xlu1 %v2456_v45  ;;  %v2235_v28 = vrot.slane %v2086_v53, %v5519_v20 }
 0x333   :  { %v2101_v10 = vpop.permute.xlu0 %2100 }
 0x334   :  { %v2089_v0 = vpop.permute.xlu1 %2088 }
 0x335   :  { %v2239_v55 = vrot.slane %v2089_v0, %v5519_v20 }
 0x337   :  { %v2107_v1 = vpop.permute.xlu0 %2106  ;;  %v2411_v7 = vsel %vm1540_vm1, %v2239_v55, %v2235_v28 }
 0x338   :  { %v2092_v43 = vpop.permute.xlu1 %2091  ;;  %v2263_v55 = vrot.slane %v2107_v1, %v5519_v20 }
 0x339   :  { %v2243_v60 = vrot.slane %v2092_v43, %v5519_v20  ;;  %v2255_v43 = vrot.slane %v2101_v10, %v5519_v20 }
 0x33b   :  { %v2113_v34 = vpop.permute.xlu0 %2112  ;;  %v2412_v49 = vsel %vm1542_vm2, %v2243_v60, %v2411_v7 }
 0x33c   :  { %v2095_v14 = vpop.permute.xlu1 %2094  ;;  %v2271_v10 = vrot.slane %v2113_v34, %v5519_v20 }
 0x33d   :  { %v2247_v42 = vrot.slane %v2095_v14, %v5519_v20 }
 0x33f   :  { %v2413_v45 = vsel %vm1544_vm3, %v2247_v42, %v2412_v49  ;;  %v2119_v3 = vpop.permute.xlu0 %2118 }
 0x340   :  { %v2459_v63 = vsel %vm1591_vm4, %v2413_v45, 0.0  ;;  %v2098_v51 = vpop.permute.xlu1 %2097  ;;  %v2279_v1 = vrot.slane %v2119_v3, %v5519_v20 }
 0x341   :  { %2460 = vadd.xlane.f32.xlu0 %v2459_v63  ;;  %v2251_v0 = vrot.slane %v2098_v51, %v5519_v20 }
 0x343   :  { %v2125_v31 = vpop.permute.xlu0 %2124  ;;  %v2414_v28 = vsel %vm1540_vm1, %v2255_v43, %v2251_v0 }
 0x344   :  { %v2104_v53 = vpop.permute.xlu1 %2103  ;;  %v2287_v34 = vrot.slane %v2125_v31, %v5519_v20 }
 0x345   :  { %v2259_v26 = vrot.slane %v2104_v53, %v5519_v20 }
 0x347   :  { %v2415_v60 = vsel %vm1542_vm2, %v2259_v26, %v2414_v28  ;;  %v2131_v51 = vpop.permute.xlu0 %2130 }
 0x348   :  { %v2110_v14 = vpop.permute.xlu1 %2109  ;;  %v2416_v7 = vsel %vm1544_vm3, %v2263_v55, %v2415_v60  ;;  %v2295_v3 = vrot.slane %v2131_v51, %v5519_v20 }
 0x349   :  { %v2462_v42 = vsel %vm1591_vm4, %v2416_v7, 0.0  ;;  %v2267_v49 = vrot.slane %v2110_v14, %v5519_v20 }
 0x34a   :  { %2463 = vadd.xlane.f32.xlu0 %v2462_v42 }
 0x34b   :  { %v2417_v0 = vsel %vm1540_vm1, %v2271_v10, %v2267_v49 }
 0x34c   :  { %v2116_v45 = vpop.permute.xlu1 %2115 }
 0x34d   :  { %v2275_v63 = vrot.slane %v2116_v45, %v5519_v20 }
 0x34f   :  { %v2137_v43 = vpop.permute.xlu0 %2136  ;;  %v2418_v26 = vsel %vm1542_vm2, %v2275_v63, %v2417_v0 }
 0x350   :  { %v2122_v53 = vpop.permute.xlu1 %2121  ;;  %v2419_v55 = vsel %vm1544_vm3, %v2279_v1, %v2418_v26  ;;  %v2303_v31 = vrot.slane %v2137_v43, %v5519_v20 }
 0x351   :  { %v2465_v28 = vsel %vm1591_vm4, %v2419_v55, 0.0  ;;  %v2283_v60 = vrot.slane %v2122_v53, %v5519_v20 }
 0x352   :  { %2466 = vadd.xlane.f32.xlu1 %v2465_v28 }
 0x353   :  { %v2143_v14 = vpop.permute.xlu0 %2142  ;;  %v2420_v49 = vsel %vm1540_vm1, %v2287_v34, %v2283_v60 }
 0x354   :  { %v2128_v7 = vpop.permute.xlu1 %2127  ;;  %v2311_v51 = vrot.slane %v2143_v14, %v5519_v20 }
 0x355   :  { %v2291_v42 = vrot.slane %v2128_v7, %v5519_v20 }
 0x357   :  { %v2149_v10 = vpop.permute.xlu0 %2148  ;;  %v2421_v45 = vsel %vm1542_vm2, %v2291_v42, %v2420_v49 }
 0x358   :  { %v2134_v63 = vpop.permute.xlu1 %2133  ;;  %v2422_v1 = vsel %vm1544_vm3, %v2295_v3, %v2421_v45  ;;  %v2319_v43 = vrot.slane %v2149_v10, %v5519_v20 }
 0x359   :  { %v2468_v0 = vsel %vm1591_vm4, %v2422_v1, 0.0  ;;  %v2299_v26 = vrot.slane %v2134_v63, %v5519_v20 }
 0x35a   :  { %2469 = vadd.xlane.f32.xlu0 %v2468_v0 }
 0x35b   :  { %v2155_v53 = vpop.permute.xlu0 %2154  ;;  %v2423_v60 = vsel %vm1540_vm1, %v2303_v31, %v2299_v26 }
 0x35c   :  { %v2140_v55 = vpop.permute.xlu1 %2139  ;;  %v2327_v14 = vrot.slane %v2155_v53, %v5519_v20 }
 0x35d   :  { %v2307_v28 = vrot.slane %v2140_v55, %v5519_v20 }
 0x35f   :  { %v2161_v34 = vpop.permute.xlu0 %2160  ;;  %v2424_v7 = vsel %vm1542_vm2, %v2307_v28, %v2423_v60 }
 0x360   :  { %v2146_v42 = vpop.permute.xlu1 %2145  ;;  %v2425_v3 = vsel %vm1544_vm3, %v2311_v51, %v2424_v7  ;;  %v2335_v10 = vrot.slane %v2161_v34, %v5519_v20 }
 0x361   :  { %v2471_v49 = vsel %vm1591_vm4, %v2425_v3, 0.0  ;;  %v2315_v45 = vrot.slane %v2146_v42, %v5519_v20 }
 0x362   :  { %2472 = vadd.xlane.f32.xlu1 %v2471_v49 }
 0x363   :  { %v2167_v63 = vpop.permute.xlu0 %2166  ;;  %v2426_v26 = vsel %vm1540_vm1, %v2319_v43, %v2315_v45 }
 0x364   :  { %v2152_v1 = vpop.permute.xlu1 %2151  ;;  %v2343_v53 = vrot.slane %v2167_v63, %v5519_v20 }
 0x365   :  { %v2323_v0 = vrot.slane %v2152_v1, %v5519_v20 }
 0x367   :  { %v2173_v31 = vpop.permute.xlu0 %2172  ;;  %v2427_v55 = vsel %vm1542_vm2, %v2323_v0, %v2426_v26 }
 0x368   :  { %v2158_v28 = vpop.permute.xlu1 %2157  ;;  %v2428_v51 = vsel %vm1544_vm3, %v2327_v14, %v2427_v55  ;;  %v2351_v34 = vrot.slane %v2173_v31, %v5519_v20 }
 0x369   :  { %v2474_v60 = vsel %vm1591_vm4, %v2428_v51, 0.0  ;;  %v2331_v7 = vrot.slane %v2158_v28, %v5519_v20 }
 0x36a   :  { %2475 = vadd.xlane.f32.xlu0 %v2474_v60 }
 0x36b   :  { %v2179_v42 = vpop.permute.xlu0 %2178  ;;  %v2429_v45 = vsel %vm1540_vm1, %v2335_v10, %v2331_v7 }
 0x36c   :  { %v2164_v3 = vpop.permute.xlu1 %2163  ;;  %v2359_v63 = vrot.slane %v2179_v42, %v5519_v20 }
 0x36d   :  { %v2339_v49 = vrot.slane %v2164_v3, %v5519_v20 }
 0x36f   :  { %v2185_v43 = vpop.permute.xlu0 %2184  ;;  %v2430_v1 = vsel %vm1542_vm2, %v2339_v49, %v2429_v45 }
 0x370   :  { %v2170_v0 = vpop.permute.xlu1 %2169  ;;  %v2431_v14 = vsel %vm1544_vm3, %v2343_v53, %v2430_v1  ;;  %v2367_v31 = vrot.slane %v2185_v43, %v5519_v20 }
 0x371   :  { %v2477_v26 = vsel %vm1591_vm4, %v2431_v14, 0.0  ;;  %v2347_v55 = vrot.slane %v2170_v0, %v5519_v20 }
 0x372   :  { %2478 = vadd.xlane.f32.xlu1 %v2477_v26 }
 0x373   :  { %v2191_v28 = vpop.permute.xlu0 %2190  ;;  %v2432_v7 = vsel %vm1540_vm1, %v2351_v34, %v2347_v55 }
 0x374   :  { %v2176_v51 = vpop.permute.xlu1 %2175  ;;  %v2375_v42 = vrot.slane %v2191_v28, %v5519_v20 }
 0x375   :  { %v2355_v60 = vrot.slane %v2176_v51, %v5519_v20 }
 0x377   :  { %v2433_v10 = vsel %vm1542_vm2, %v2355_v60, %v2432_v7  ;;  %v2197_v53 = vpop.permute.xlu0 %2196 }
 0x378   :  { %v2182_v3 = vpop.permute.xlu1 %2181  ;;  %v2434_v49 = vsel %vm1544_vm3, %v2359_v63, %v2433_v10  ;;  %v2383_v43 = vrot.slane %v2197_v53, %v5519_v20 }
 0x379   :  { %v2480_v45 = vsel %vm1591_vm4, %v2434_v49, 0.0  ;;  %v2363_v1 = vrot.slane %v2182_v3, %v5519_v20 }
 0x37a   :  { %2481 = vadd.xlane.f32.xlu0 %v2480_v45 }
 0x37b   :  { %v2435_v26 = vsel %vm1540_vm1, %v2367_v31, %v2363_v1  ;;  %v2203_v55 = vpop.permute.xlu0 %2202 }
 0x37c   :  { %v2188_v0 = vpop.permute.xlu1 %2187  ;;  %v2391_v28 = vrot.slane %v2203_v55, %v5519_v20 }
 0x37d   :  { %v2371_v14 = vrot.slane %v2188_v0, %v5519_v20 }
 0x37f   :  { %v2436_v34 = vsel %vm1542_vm2, %v2371_v14, %v2435_v26  ;;  %v2209_v3 = vpop.permute.xlu0 %2208 }
 0x380   :  { %v2194_v51 = vpop.permute.xlu1 %2193  ;;  %v2437_v60 = vsel %vm1544_vm3, %v2375_v42, %v2436_v34  ;;  %v2399_v53 = vrot.slane %v2209_v3, %v5519_v20 }
 0x381   :  { %v2483_v63 = vsel %vm1591_vm4, %v2437_v60, 0.0  ;;  %v2379_v7 = vrot.slane %v2194_v51, %v5519_v20 }
 0x382   :  { %2484 = vadd.xlane.f32.xlu1 %v2483_v63 }
 0x383   :  { %v2438_v45 = vsel %vm1540_vm1, %v2383_v43, %v2379_v7  ;;  %v2215_v26 = vpop.permute.xlu0 %2214 }
 0x384   :  { %v2200_v10 = vpop.permute.xlu1 %2199  ;;  %v2407_v55 = vrot.slane %v2215_v26, %v5519_v20 }
 0x385   :  { %v2387_v49 = vrot.slane %v2200_v10, %v5519_v20 }
 0x387   :  { %v2439_v1 = vsel %vm1542_vm2, %v2387_v49, %v2438_v45 }
 0x388   :  { %v2206_v31 = vpop.permute.xlu1 %2205  ;;  %v2440_v0 = vsel %vm1544_vm3, %v2391_v28, %v2439_v1 }
 0x389   :  { %v2486_v14 = vsel %vm1591_vm4, %v2440_v0, 0.0  ;;  %v2395_v42 = vrot.slane %v2206_v31, %v5519_v20 }
 0x38a   :  { %2487 = vadd.xlane.f32.xlu0 %v2486_v14 }
 0x38b   :  { %v2441_v60 = vsel %vm1540_vm1, %v2399_v53, %v2395_v42 }
 0x38c   :  { %v2212_v34 = vpop.permute.xlu1 %2211 }
 0x38d   :  { %v2403_v51 = vrot.slane %v2212_v34, %v5519_v20 }
 0x38f   :  { %v2442_v63 = vsel %vm1542_vm2, %v2403_v51, %v2441_v60 }
 0x390   :  { %v2443_v7 = vsel %vm1544_vm3, %v2407_v55, %v2442_v63 }
 0x391   :  { %v2489_v43 = vsel %vm1591_vm4, %v2443_v7, 0.0 }
 0x392   :  { %2490 = vadd.xlane.f32.xlu1 %v2489_v43 }
 0x3be   :  { %v2458_v10 = vpop.xlane.xlu1 %2457 }
 0x3bf   :  { %4067 = vrcp.f32 %v2458_v10 }
 0x3c9   :  { %v4068_v49 = vpop.eup %4067 }
 0x3ca   :  { %v2519_v28 = vrot.slane %v4068_v49, %v4419_v50  ;;  %v2523_v3 = vrot.slane %v4068_v49, %v4903_v62  ;;  %v2531_v1 = vrot.slane %v4068_v49, %v4909_v27  ;;  %v2527_v31 = vrot.slane %v4068_v49, %v4906_v9 }
 0x3cc   :  { %v2756_v45 = vmul.f32 %v4924_v6, %v2519_v28  ;;  %v2757_v20 = vmul.f32 %v4926_v52, %v2523_v3  ;;  %v2759_v14 = vmul.f32 %v4942_v15, %v2531_v1  ;;  %v2758_v42 = vmul.f32 %v4936_v57, %v2527_v31 }
 0x3ce   :  { %v2461_v0 = vpop.xlane.xlu0 %2460  ;;  %2806 = vperm.xlu0 %3944, %v2756_v45   ;;  %2811 = vperm.xlu1 %3945, %v2757_v20  }
 0x3cf   :  { %4069 = vrcp.f32 %v2461_v0 }
 0x3d2   :  { %2821 = vperm.xlu0 %3944, %v2759_v14   ;;  %2816 = vperm.xlu1 %3945, %v2758_v42  }
 0x3d7   :  { %v2464_v26 = vpop.xlane.xlu0 %2463 }
 0x3d8   :  { %4071 = vrcp.f32 %v2464_v26 }
 0x3d9   :  { %v4070_v53 = vpop.eup %4069 }
 0x3da   :  { %v2539_v6 = vrot.slane %v4070_v53, %v4903_v62  ;;  %v2535_v52 = vrot.slane %v4070_v53, %v4419_v50  ;;  %v2547_v55 = vrot.slane %v4070_v53, %v4909_v27  ;;  %v2543_v60 = vrot.slane %v4070_v53, %v4906_v9 }
 0x3dc   :  { %v2761_v34 = vmul.f32 %v4953_v37, %v2539_v6  ;;  %v2760_v51 = vmul.f32 %v4948_v13, %v2535_v52  ;;  %v2763_v15 = vmul.f32 %v4974_v33, %v2547_v55  ;;  %v2762_v63 = vmul.f32 %v4966_v38, %v2543_v60 }
 0x3de   :  { %2831 = vperm.xlu0 %3944, %v2761_v34   ;;  %2826 = vperm.xlu1 %3945, %v2760_v51  }
 0x3df   :  { %v2467_v57 = vpop.xlane.xlu1 %2466 }
 0x3e0   :  { %4073 = vrcp.f32 %v2467_v57 }
 0x3e2   :  { %2841 = vperm.xlu0 %3944, %v2763_v15   ;;  %2836 = vperm.xlu1 %3945, %v2762_v63   ;;  %v4072_v7 = vpop.eup %4071 }
 0x3e3   :  { %v2555_v43 = vrot.slane %v4072_v7, %v4903_v62  ;;  %v2551_v37 = vrot.slane %v4072_v7, %v4419_v50  ;;  %v2563_v49 = vrot.slane %v4072_v7, %v4909_v27  ;;  %v2559_v28 = vrot.slane %v4072_v7, %v4906_v9 }
 0x3e5   :  { %v2765_v13 = vmul.f32 %v4958_v41, %v2555_v43  ;;  %v2764_v10 = vmul.f32 %v4987_v25, %v2551_v37  ;;  %v2767_v38 = vmul.f32 %v4969_v44, %v2563_v49  ;;  %v2766_v3 = vmul.f32 %v4998_v30, %v2559_v28 }
 0x3e7   :  { %2851 = vperm.xlu0 %3944, %v2765_v13   ;;  %2846 = vperm.xlu1 %3945, %v2764_v10   ;;  %v2470_v33 = vpop.xlane.xlu0 %2469 }
 0x3e8   :  { %4075 = vrcp.f32 %v2470_v33 }
 0x3ea   :  { %v4074_v45 = vpop.eup %4073 }
 0x3eb   :  { %2861 = vperm.xlu0 %3944, %v2767_v38   ;;  %2856 = vperm.xlu1 %3945, %v2766_v3   ;;  %v2571_v20 = vrot.slane %v4074_v45, %v4903_v62  ;;  %v2567_v41 = vrot.slane %v4074_v45, %v4419_v50  ;;  %v2579_v31 = vrot.slane %v4074_v45, %v4909_v27 }
 0x3ec   :  { %v2575_v0 = vrot.slane %v4074_v45, %v4906_v9 }
 0x3ed   :  { %v2769_v25 = vmul.f32 %v4977_v48, %v2571_v20  ;;  %v2768_v1 = vmul.f32 %v5008_v19, %v2567_v41  ;;  %v2771_v44 = vmul.f32 %v4985_v61, %v2579_v31 }
 0x3ee   :  { %v2770_v30 = vmul.f32 %v5016_v8, %v2575_v0 }
 0x3ef   :  { %v2473_v14 = vpop.xlane.xlu1 %2472  ;;  %2871 = vperm.xlu0 %3944, %v2769_v25   ;;  %2866 = vperm.xlu1 %3945, %v2768_v1  }
 0x3f0   :  { %4077 = vrcp.f32 %v2473_v14 }
 0x3f2   :  { %v4076_v42 = vpop.eup %4075 }
 0x3f3   :  { %2881 = vperm.xlu0 %3944, %v2771_v44   ;;  %2876 = vperm.xlu1 %3945, %v2770_v30   ;;  %v2587_v26 = vrot.slane %v4076_v42, %v4903_v62  ;;  %v2583_v48 = vrot.slane %v4076_v42, %v4419_v50  ;;  %v2595_v6 = vrot.slane %v4076_v42, %v4909_v27 }
 0x3f4   :  { %v2591_v52 = vrot.slane %v4076_v42, %v4906_v9 }
 0x3f5   :  { %v2773_v19 = vmul.f32 %v4995_v54, %v2587_v26  ;;  %v2772_v53 = vmul.f32 %v5025_v32, %v2583_v48  ;;  %v2775_v8 = vmul.f32 %v5006_v35, %v2595_v6 }
 0x3f6   :  { %v2774_v34 = vmul.f32 %v5031_v47, %v2591_v52 }
 0x3f7   :  { %2891 = vperm.xlu0 %3944, %v2773_v19   ;;  %2886 = vperm.xlu1 %3945, %v2772_v53   ;;  %v2476_v61 = vpop.xlane.xlu0 %2475 }
 0x3f8   :  { %4079 = vrcp.f32 %v2476_v61 }
 0x3fa   :  { %v4078_v51 = vpop.eup %4077 }
 0x3fb   :  { %2901 = vperm.xlu0 %3944, %v2775_v8   ;;  %2896 = vperm.xlu1 %3945, %v2774_v34   ;;  %v2603_v55 = vrot.slane %v4078_v51, %v4903_v62  ;;  %v2599_v54 = vrot.slane %v4078_v51, %v4419_v50  ;;  %v2611_v57 = vrot.slane %v4078_v51, %v4909_v27  ;;  %v5521_v8 = vld [vmem:[#allocation36_spill] sm:$0xff] }
 0x3fc   :  { %v2607_v15 = vrot.slane %v4078_v51, %v4906_v9 }
 0x3fd   :  { %v2777_v32 = vmul.f32 %v5023_v16, %v2603_v55  ;;  %v2776_v60 = vmul.f32 %v5045_v12, %v2599_v54  ;;  %v2779_v35 = vmul.f32 %v5035_v18, %v2611_v57 }
 0x3fe   :  { %v2778_v47 = vmul.f32 %v5054_v24, %v2607_v15  ;;  %v5524_v15 = vld [vmem:[#allocation37_spill] sm:$0xff] }
 0x3ff   :  { %v2479_v63 = vpop.xlane.xlu1 %2478  ;;  %2911 = vperm.xlu0 %3944, %v2777_v32   ;;  %2906 = vperm.xlu1 %3945, %v2776_v60  }
 0x400   :  { %4081 = vrcp.f32 %v2479_v63 }
 0x402   :  { %v4080_v7 = vpop.eup %4079 }
 0x403   :  { %2921 = vperm.xlu0 %3944, %v2779_v35   ;;  %2916 = vperm.xlu1 %3945, %v2778_v47   ;;  %v2619_v43 = vrot.slane %v4080_v7, %v4903_v62  ;;  %v2615_v16 = vrot.slane %v4080_v7, %v4419_v50  ;;  %v2627_v13 = vrot.slane %v4080_v7, %v4909_v27  ;;  %v5525_v35 = vld [vmem:[#allocation40_spill] sm:$0xff] }
 0x404   :  { %v2623_v10 = vrot.slane %v4080_v7, %v4906_v9 }
 0x405   :  { %v2781_v12 = vmul.f32 %v5043_v22, %v2619_v43  ;;  %v2780_v37 = vmul.f32 %v5064_v29, %v2615_v16  ;;  %v2783_v24 = vmul.f32 %v5052_v36, %v2627_v13  ;;  %v5526_v43 = vld [vmem:[#allocation38_spill] sm:$0xff]  ;;  %v5528_v13 = vld [vmem:[#allocation20_spill] sm:$0xff] }
 0x406   :  { %v2782_v49 = vmul.f32 %v5075_v11, %v2623_v10 }
 0x407   :  { %2931 = vperm.xlu0 %3944, %v2781_v12   ;;  %2926 = vperm.xlu1 %3945, %v2780_v37   ;;  %v2482_v18 = vpop.xlane.xlu0 %2481  ;;  %v5527_v12 = vld [vmem:[#allocation33_spill] sm:$0xff] }
 0x408   :  { %4083 = vrcp.f32 %v2482_v18 }
 0x40a   :  { %v4082_v28 = vpop.eup %4081 }
 0x40b   :  { %2941 = vperm.xlu0 %3944, %v2783_v24   ;;  %2936 = vperm.xlu1 %3945, %v2782_v49   ;;  %v2635_v33 = vrot.slane %v4082_v28, %v4903_v62  ;;  %v2631_v22 = vrot.slane %v4082_v28, %v4419_v50  ;;  %v2643_v3 = vrot.slane %v4082_v28, %v4909_v27 }
 0x40c   :  { %v2639_v45 = vrot.slane %v4082_v28, %v4906_v9 }
 0x40d   :  { %v2785_v29 = vmul.f32 %v5062_v23, %v2635_v33  ;;  %v2784_v38 = vmul.f32 %v5085_v56, %v2631_v22  ;;  %v2787_v36 = vmul.f32 %v5072_v58, %v2643_v3 }
 0x40e   :  { %v2786_v11 = vmul.f32 %v5095_v46, %v2639_v45 }
 0x40f   :  { %2951 = vperm.xlu0 %3944, %v2785_v29   ;;  %2946 = vperm.xlu1 %3945, %v2784_v38   ;;  %v2485_v46 = vpop.xlane.xlu1 %2484 }
 0x412   :  { %v4084_v20 = vpop.eup %4083 }
 0x413   :  { %2961 = vperm.xlu0 %3944, %v2787_v36   ;;  %2956 = vperm.xlu1 %3945, %v2786_v11   ;;  %v2651_v41 = vrot.slane %v4084_v20, %v4903_v62  ;;  %v2647_v25 = vrot.slane %v4084_v20, %v4419_v50  ;;  %v2655_v1 = vrot.slane %v4084_v20, %v4906_v9 }
 0x414   :  { %v2659_v31 = vrot.slane %v4084_v20, %v4909_v27 }
 0x415   :  { %v2789_v23 = vmul.f32 %v5083_v4, %v2651_v41  ;;  %v2788_v56 = vmul.f32 %v5105_v5, %v2647_v25  ;;  %v2790_v0 = vmul.f32 %v5110_v17, %v2655_v1 }
 0x416   :  { %v2791_v14 = vmul.f32 %v5093_v39, %v2659_v31 }
 0x417   :  { %2971 = vperm.xlu0 %3944, %v2789_v23   ;;  %2966 = vperm.xlu1 %3945, %v2788_v56   ;;  %v2488_v58 = vpop.xlane.xlu0 %2487 }
 0x418   :  { %4085 = vrcp.f32 %v2488_v58 }
 0x419   :  { %4087 = vrcp.f32 %v2485_v46 }
 0x41b   :  { %2976 = vperm.xlu0 %3944, %v2790_v0   ;;  %2981 = vperm.xlu1 %3945, %v2791_v14  }
 0x41f   :  { %v2491_v44 = vpop.xlane.xlu1 %2490 }
 0x420   :  { %4089 = vrcp.f32 %v2491_v44 }
 0x422   :  { %v4086_v4 = vpop.eup %4085 }
 0x423   :  { %v2683_v5 = vrot.slane %v4086_v4, %v4903_v62  ;;  %v2679_v30 = vrot.slane %v4086_v4, %v4419_v50  ;;  %v2691_v48 = vrot.slane %v4086_v4, %v4909_v27  ;;  %v2687_v17 = vrot.slane %v4086_v4, %v4906_v9  ;;  %v4088_v19 = vpop.eup %4087 }
 0x424   :  { %v2663_v6 = vrot.slane %v4088_v19, %v4419_v50  ;;  %v2667_v52 = vrot.slane %v4088_v19, %v4903_v62  ;;  %v2671_v51 = vrot.slane %v4088_v19, %v4906_v9 }
 0x425   :  { %v2797_v42 = vmul.f32 %v5120_v2, %v2683_v5  ;;  %v2796_v26 = vmul.f32 %v5135_v40, %v2679_v30  ;;  %v2799_v39 = vmul.f32 %v5127_v59, %v2691_v48  ;;  %v2798_v53 = vmul.f32 %v5141_v21, %v2687_v17  ;;  %v5520_v2 = vld [vmem:[#allocation34_spill] sm:$0xff]  ;;  %v5522_v59 = vld [vmem:[#allocation35_spill] sm:$0xff]  ;;  %v5529_v17 = vld [vmem:[#allocation21_spill] sm:$0xff] }
 0x426   :  { %v2792_v40 = vmul.f32 %v5520_v2, %v2663_v6  ;;  %v2793_v34 = vmul.f32 %v5521_v8, %v2667_v52  ;;  %v2794_v54 = vmul.f32 %v5522_v59, %v2671_v51  ;;  %v5523_v21 = vld [vmem:[#allocation39_spill] sm:$0xff] }
 0x427   :  { %3011 = vperm.xlu0 %3944, %v2797_v42   ;;  %3006 = vperm.xlu1 %3945, %v2796_v26  }
 0x42a   :  { %v4090_v61 = vpop.eup %4089 }
 0x42b   :  { %3021 = vperm.xlu0 %3944, %v2799_v39   ;;  %3016 = vperm.xlu1 %3945, %v2798_v53   ;;  %v2695_v55 = vrot.slane %v4090_v61, %v4419_v50  ;;  %v2699_v60 = vrot.slane %v4090_v61, %v4903_v62  ;;  %v2703_v57 = vrot.slane %v4090_v61, %v4906_v9 }
 0x42c   :  { %v2707_v7 = vrot.slane %v4090_v61, %v4909_v27  ;;  %v2675_v50 = vrot.slane %v4088_v19, %v4909_v27 }
 0x42d   :  { %v2800_v32 = vmul.f32 %v5523_v21, %v2695_v55  ;;  %v2801_v63 = vmul.f32 %v5524_v15, %v2699_v60  ;;  %v2802_v47 = vmul.f32 %v5525_v35, %v2703_v57 }
 0x42e   :  { %v2803_v16 = vmul.f32 %v5526_v43, %v2707_v7  ;;  %v2795_v37 = vmul.f32 %v5527_v12, %v2675_v50 }
 0x42f   :  { %2986 = vperm.xlu0 %3944, %v2792_v40   ;;  %2991 = vperm.xlu1 %3945, %v2793_v34  }
 0x433   :  { %2996 = vperm.xlu0 %3944, %v2794_v54   ;;  %3026 = vperm.xlu1 %3945, %v2800_v32  }
 0x437   :  { %3031 = vperm.xlu0 %3944, %v2801_v63   ;;  %3036 = vperm.xlu1 %3945, %v2802_v47  }
 0x43b   :  { %3041 = vperm.xlu0 %3944, %v2803_v16   ;;  %3001 = vperm.xlu1 %3945, %v2795_v37  }
 0x44d   :  { %v2812_v62 = vpop.permute.xlu1 %2811  ;;  %v2807_v9 = vpop.permute.xlu0 %2806 }
 0x44e   :  { %v3045_v10 = vmul.f32 %v2812_v62, %v5528_v13  ;;  %v3044_v18 = vmul.f32 %v2807_v9, %v5528_v13 }
 0x450   :  { %v3098_v24 = vrot.slane %v3045_v10, 4  ;;  %v3092_v49 = vrot.slane %v3044_v18, 4 }
 0x451   :  { %v2817_v28 = vpop.permute.xlu1 %2816  ;;  %v2822_v33 = vpop.permute.xlu0 %2821 }
 0x452   :  { %v3099_v22 = vadd.f32 %v3098_v24, %v3045_v10  ;;  %v3093_v27 = vadd.f32 %v3092_v49, %v3044_v18  ;;  %v3046_v29 = vmul.f32 %v2817_v28, %v5528_v13  ;;  %v3047_v38 = vmul.f32 %v2822_v33, %v5528_v13  ;;  %v5530_v24 = vld [vmem:[#allocation22_spill] sm:$0xff] }
 0x454   :  { %v3100_v3 = vrot.slane %v3099_v22, 2  ;;  %v3094_v45 = vrot.slane %v3093_v27, 2  ;;  %v3104_v36 = vrot.slane %v3046_v29, 4  ;;  %v3110_v11 = vrot.slane %v3047_v38, 4 }
 0x456   :  { %v3101_v20 = vadd.f32 %v3100_v3, %v3099_v22  ;;  %v3095_v41 = vadd.f32 %v3094_v45, %v3093_v27  ;;  %v3105_v25 = vadd.f32 %v3104_v36, %v3046_v29  ;;  %v3111_v23 = vadd.f32 %v3110_v11, %v3047_v38 }
 0x458   :  { %v3102_v56 = vrot.slane %v3101_v20, 1  ;;  %v3096_v1 = vrot.slane %v3095_v41, 1  ;;  %v3106_v31 = vrot.slane %v3105_v25, 2  ;;  %v3112_v58 = vrot.slane %v3111_v23, 2 }
 0x45a   :  { %v3103_v46 = vadd.f32 %v3102_v56, %v3101_v20  ;;  %v3097_v0 = vadd.f32 %v3096_v1, %v3095_v41  ;;  %v3107_v14 = vadd.f32 %v3106_v31, %v3105_v25  ;;  %v3113_v44 = vadd.f32 %v3112_v58, %v3111_v23 }
 0x45c   :  { %v3791_v4 = vpack.c.bf16 %v3103_v46, %v3103_v46  ;;  %v3790_v5 = vpack.c.bf16 %v3097_v0, %v3097_v0  ;;  %v3108_v30 = vrot.slane %v3107_v14, 1  ;;  %v3114_v42 = vrot.slane %v3113_v44, 1 }
 0x45d   :  { %v2827_v26 = vpop.permute.xlu1 %2826  ;;  %v2832_v48 = vpop.permute.xlu0 %2831 }
 0x45e   :  { %v3048_v19 = vmul.f32 %v2827_v26, %v5529_v17  ;;  %v3049_v39 = vmul.f32 %v2832_v48, %v5529_v17  ;;  %v3109_v53 = vadd.f32 %v3108_v30, %v3107_v14  ;;  %v3115_v6 = vadd.f32 %v3114_v42, %v3113_v44 }
 0x45f   :  { %v3573_v2 = vunpack.c.l.b16 %v3791_v4  ;;  %v3572_v40 = vunpack.c.l.b16 %v3790_v5 }
 0x460   :  { %v3116_v52 = vrot.slane %v3048_v19, 4  ;;  %v3122_v61 = vrot.slane %v3049_v39, 4  ;;  %v3792_v8 = vpack.c.bf16 %v3109_v53, %v3109_v53  ;;  %v3793_v60 = vpack.c.bf16 %v3115_v6, %v3115_v6  ;;  %v5531_v6 = vld [vmem:[#allocation23_spill] sm:$0xff] }
 0x461   :  { %v2837_v34 = vpop.permute.xlu1 %2836  ;;  %v2842_v51 = vpop.permute.xlu0 %2841  ;;  %v3620_v47 = vsel %vm1540_vm1, %v3573_v2, %v3572_v40 }
 0x462   :  { %v3117_v55 = vadd.f32 %v3116_v52, %v3048_v19  ;;  %v3123_v59 = vadd.f32 %v3122_v61, %v3049_v39  ;;  %v3050_v54 = vmul.f32 %v2837_v34, %v5529_v17  ;;  %v3051_v21 = vmul.f32 %v2842_v51, %v5529_v17 }
 0x463   :  { %v3574_v32 = vunpack.c.l.b16 %v3792_v8  ;;  %v3575_v12 = vunpack.c.l.b16 %v3793_v60 }
 0x464   :  { %v3118_v57 = vrot.slane %v3117_v55, 2  ;;  %v3124_v15 = vrot.slane %v3123_v59, 2  ;;  %v3128_v63 = vrot.slane %v3050_v54, 4  ;;  %v3134_v35 = vrot.slane %v3051_v21, 4 }
 0x465   :  { %v3621_v16 = vsel %vm1542_vm2, %v3574_v32, %v3620_v47 }
 0x466   :  { %v3119_v7 = vadd.f32 %v3118_v57, %v3117_v55  ;;  %v3125_v50 = vadd.f32 %v3124_v15, %v3123_v59  ;;  %v3129_v43 = vadd.f32 %v3128_v63, %v3050_v54  ;;  %v3135_v37 = vadd.f32 %v3134_v35, %v3051_v21  ;;  %v2847_v62 = vpop.permute.xlu1 %2846  ;;  %v2852_v9 = vpop.permute.xlu0 %2851 }
 0x467   :  { %v3052_v49 = vmul.f32 %v2847_v62, %v5530_v24  ;;  %v3053_v33 = vmul.f32 %v2852_v9, %v5530_v24  ;;  %v3622_v3 = vsel %vm1544_vm3, %v3575_v12, %v3621_v16 }
 0x468   :  { %v3120_v13 = vrot.slane %v3119_v7, 1  ;;  %v3126_v10 = vrot.slane %v3125_v50, 1  ;;  %v3130_v18 = vrot.slane %v3129_v43, 2  ;;  %v3136_v28 = vrot.slane %v3135_v37, 2 }
 0x469   :  { %v3140_v38 = vrot.slane %v3052_v49, 4  ;;  %v3146_v36 = vrot.slane %v3053_v33, 4 }
 0x46a   :  { %v3121_v22 = vadd.f32 %v3120_v13, %v3119_v7  ;;  %v3127_v27 = vadd.f32 %v3126_v10, %v3125_v50  ;;  %v3131_v29 = vadd.f32 %v3130_v18, %v3129_v43  ;;  %v3137_v45 = vadd.f32 %v3136_v28, %v3135_v37  ;;  %v2857_v11 = vpop.permute.xlu1 %2856  ;;  %v2862_v20 = vpop.permute.xlu0 %2861 }
 0x46b   :  { %v3141_v56 = vadd.f32 %v3140_v38, %v3052_v49  ;;  %v3147_v31 = vadd.f32 %v3146_v36, %v3053_v33  ;;  %v3054_v58 = vmul.f32 %v2857_v11, %v5530_v24  ;;  %v3055_v46 = vmul.f32 %v2862_v20, %v5530_v24 }
 0x46c   :  { %v3794_v41 = vpack.c.bf16 %v3121_v22, %v3121_v22  ;;  %v3795_v25 = vpack.c.bf16 %v3127_v27, %v3127_v27  ;;  %v3132_v23 = vrot.slane %v3131_v29, 1  ;;  %v3138_v1 = vrot.slane %v3137_v45, 1 }
 0x46d   :  { %v3142_v4 = vrot.slane %v3141_v56, 2  ;;  %v3148_v30 = vrot.slane %v3147_v31, 2  ;;  %v3152_v42 = vrot.slane %v3054_v58, 4  ;;  %v3158_v26 = vrot.slane %v3055_v46, 4 }
 0x46e   :  { %v3576_v0 = vunpack.c.l.b16 %v3794_v41  ;;  %v3577_v14 = vunpack.c.l.b16 %v3795_v25  ;;  %v3133_v44 = vadd.f32 %v3132_v23, %v3131_v29  ;;  %v3139_v5 = vadd.f32 %v3138_v1, %v3137_v45  ;;  %v2867_v48 = vpop.permute.xlu1 %2866  ;;  %v2872_v17 = vpop.permute.xlu0 %2871  ;;  %v5532_v23 = vld [vmem:[#allocation24_spill] sm:$0xff] }
 0x46f   :  { %v3143_v53 = vadd.f32 %v3142_v4, %v3141_v56  ;;  %v3056_v52 = vmul.f32 %v2867_v48, %v5531_v6  ;;  %v3149_v40 = vadd.f32 %v3148_v30, %v3147_v31  ;;  %v3153_v8 = vadd.f32 %v3152_v42, %v3054_v58 }
 0x470   :  { %v3624_v19 = vsel %vm3623_vm5, %v3576_v0, %v3622_v3  ;;  %v3796_v39 = vpack.c.bf16 %v3133_v44, %v3133_v44  ;;  %v3797_v2 = vpack.c.bf16 %v3139_v5, %v3139_v5  ;;  %v3159_v55 = vadd.f32 %v3158_v26, %v3055_v46 }
 0x471   :  { %v3626_v61 = vsel %vm3625_vm6, %v3577_v14, %v3624_v19  ;;  %v3144_v51 = vrot.slane %v3143_v53, 1  ;;  %v3164_v59 = vrot.slane %v3056_v52, 4  ;;  %v3150_v21 = vrot.slane %v3149_v40, 1 }
 0x472   :  { %v3578_v34 = vunpack.c.l.b16 %v3796_v39  ;;  %v3579_v54 = vunpack.c.l.b16 %v3797_v2  ;;  %v3154_v32 = vrot.slane %v3153_v8, 2  ;;  %v3057_v60 = vmul.f32 %v2872_v17, %v5531_v6  ;;  %v2877_v57 = vpop.permute.xlu1 %2876  ;;  %v2882_v15 = vpop.permute.xlu0 %2881 }
 0x473   :  { %v3145_v35 = vadd.f32 %v3144_v51, %v3143_v53  ;;  %v3160_v47 = vrot.slane %v3159_v55, 2  ;;  %v3165_v7 = vadd.f32 %v3164_v59, %v3056_v52  ;;  %v3151_v43 = vadd.f32 %v3150_v21, %v3149_v40 }
 0x474   :  { %v3628_v63 = vsel %vm3627_vm7, %v3578_v34, %v3626_v61  ;;  %v3155_v16 = vadd.f32 %v3154_v32, %v3153_v8  ;;  %v3170_v12 = vrot.slane %v3057_v60, 4  ;;  %v3058_v49 = vmul.f32 %v2877_v57, %v5531_v6 }
 0x475   :  { %v3630_v50 = vsel %vm3629_vm8, %v3579_v54, %v3628_v63  ;;  %v3798_v62 = vpack.c.bf16 %v3145_v35, %v3145_v35  ;;  %v3161_v9 = vadd.f32 %v3160_v47, %v3159_v55  ;;  %v3166_v13 = vrot.slane %v3165_v7, 2 }
 0x476   :  { %v3666_v37 = vpack.c.b16 %v3630_v50, %v3630_v50  ;;  %v3799_v10 = vpack.c.bf16 %v3151_v43, %v3151_v43  ;;  %v3156_v18 = vrot.slane %v3155_v16, 1  ;;  %v3171_v24 = vadd.f32 %v3170_v12, %v3057_v60  ;;  %v2887_v28 = vpop.permute.xlu1 %2886  ;;  %v2892_v33 = vpop.permute.xlu0 %2891 }
 0x477   :  { %v3580_v22 = vunpack.c.l.b16 %v3798_v62  ;;  %v3162_v27 = vrot.slane %v3161_v9, 1  ;;  %v3167_v29 = vadd.f32 %v3166_v13, %v3165_v7  ;;  %v3059_v38 = vmul.f32 %v2882_v15, %v5531_v6 }
 0x478   :  { %3678 = vst [vmem:[#allocation14] sm:$0xf] %v3666_v37  ;;  %v3581_v3 = vunpack.c.l.b16 %v3799_v10  ;;  %v3157_v45 = vadd.f32 %v3156_v18, %v3155_v16  ;;  %v3172_v36 = vrot.slane %v3171_v24, 2  ;;  %v3176_v11 = vrot.slane %v3058_v49, 4  ;;  %v5533_v10 = vld [vmem:[#allocation25_spill] sm:$0xff] }
 0x479   :  { %v3163_v20 = vadd.f32 %v3162_v27, %v3161_v9  ;;  %v3168_v41 = vrot.slane %v3167_v29, 1  ;;  %v3182_v25 = vrot.slane %v3059_v38, 4  ;;  %v3060_v56 = vmul.f32 %v2887_v28, %v5532_v23 }
 0x47a   :  { %v3631_v1 = vsel %vm1540_vm1, %v3581_v3, %v3580_v22  ;;  %v3800_v31 = vpack.c.bf16 %v3157_v45, %v3157_v45  ;;  %v3173_v58 = vadd.f32 %v3172_v36, %v3171_v24  ;;  %v3177_v46 = vadd.f32 %v3176_v11, %v3058_v49  ;;  %v2897_v0 = vpop.permute.xlu1 %2896  ;;  %v2902_v14 = vpop.permute.xlu0 %2901 }
 0x47b   :  { %v3801_v44 = vpack.c.bf16 %v3163_v20, %v3163_v20  ;;  %v3169_v4 = vadd.f32 %v3168_v41, %v3167_v29  ;;  %v3183_v5 = vadd.f32 %v3182_v25, %v3059_v38  ;;  %v3188_v30 = vrot.slane %v3060_v56, 4 }
 0x47c   :  { %v3582_v42 = vunpack.c.l.b16 %v3800_v31  ;;  %v3174_v26 = vrot.slane %v3173_v58, 1  ;;  %v3178_v48 = vrot.slane %v3177_v46, 2  ;;  %v3061_v17 = vmul.f32 %v2892_v33, %v5532_v23 }
 0x47d   :  { %v3583_v19 = vunpack.c.l.b16 %v3801_v44  ;;  %v3802_v39 = vpack.c.bf16 %v3169_v4, %v3169_v4  ;;  %v3184_v53 = vrot.slane %v3183_v5, 2  ;;  %v3189_v6 = vadd.f32 %v3188_v30, %v3060_v56 }
 0x47e   :  { %v3632_v52 = vsel %vm1542_vm2, %v3582_v42, %v3631_v1  ;;  %v3175_v61 = vadd.f32 %v3174_v26, %v3173_v58  ;;  %v3179_v2 = vadd.f32 %v3178_v48, %v3177_v46  ;;  %v3194_v40 = vrot.slane %v3061_v17, 4  ;;  %v2907_v8 = vpop.permute.xlu1 %2906  ;;  %v2912_v34 = vpop.permute.xlu0 %2911 }
 0x47f   :  { %v3633_v51 = vsel %vm1544_vm3, %v3583_v19, %v3632_v52  ;;  %v3584_v55 = vunpack.c.l.b16 %v3802_v39  ;;  %v3185_v59 = vadd.f32 %v3184_v53, %v3183_v5  ;;  %v3190_v54 = vrot.slane %v3189_v6, 2 }
 0x480   :  { %v3803_v21 = vpack.c.bf16 %v3175_v61, %v3175_v61  ;;  %v3180_v32 = vrot.slane %v3179_v2, 1  ;;  %v3195_v60 = vadd.f32 %v3194_v40, %v3061_v17  ;;  %v3062_v57 = vmul.f32 %v2897_v0, %v5532_v23 }
 0x481   :  { %v3634_v15 = vsel %vm3623_vm5, %v3584_v55, %v3633_v51  ;;  %v3186_v63 = vrot.slane %v3185_v59, 1  ;;  %v3191_v35 = vadd.f32 %v3190_v54, %v3189_v6  ;;  %v3063_v47 = vmul.f32 %v2902_v14, %v5532_v23 }
 0x482   :  { %v3585_v7 = vunpack.c.l.b16 %v3803_v21  ;;  %v3181_v50 = vadd.f32 %v3180_v32, %v3179_v2  ;;  %v3196_v43 = vrot.slane %v3195_v60, 2  ;;  %v3200_v16 = vrot.slane %v3062_v57, 4  ;;  %v2917_v12 = vpop.permute.xlu1 %2916  ;;  %v2922_v37 = vpop.permute.xlu0 %2921 }
 0x483   :  { %v3187_v62 = vadd.f32 %v3186_v63, %v3185_v59  ;;  %v3192_v9 = vrot.slane %v3191_v35, 1  ;;  %v3206_v13 = vrot.slane %v3063_v47, 4  ;;  %v3064_v18 = vmul.f32 %v2907_v8, %v5533_v10  ;;  %v5534_v8 = vld [vmem:[#allocation26_spill] sm:$0xff] }
 0x484   :  { %v3635_v24 = vsel %vm3625_vm6, %v3585_v7, %v3634_v15  ;;  %v3804_v49 = vpack.c.bf16 %v3181_v50, %v3181_v50  ;;  %v3197_v28 = vadd.f32 %v3196_v43, %v3195_v60  ;;  %v3201_v33 = vadd.f32 %v3200_v16, %v3062_v57 }
 0x485   :  { %v3805_v22 = vpack.c.bf16 %v3187_v62, %v3187_v62  ;;  %v3193_v27 = vadd.f32 %v3192_v9, %v3191_v35  ;;  %v3207_v29 = vadd.f32 %v3206_v13, %v3063_v47  ;;  %v3212_v38 = vrot.slane %v3064_v18, 4 }
 0x486   :  { %v3586_v3 = vunpack.c.l.b16 %v3804_v49  ;;  %v3198_v45 = vrot.slane %v3197_v28, 1  ;;  %v3202_v36 = vrot.slane %v3201_v33, 2  ;;  %v3065_v11 = vmul.f32 %v2912_v34, %v5533_v10  ;;  %v2927_v20 = vpop.permute.xlu1 %2926  ;;  %v2932_v41 = vpop.permute.xlu0 %2931 }
 0x487   :  { %v3587_v25 = vunpack.c.l.b16 %v3805_v22  ;;  %v3806_v23 = vpack.c.bf16 %v3193_v27, %v3193_v27  ;;  %v3208_v56 = vrot.slane %v3207_v29, 2  ;;  %v3213_v1 = vadd.f32 %v3212_v38, %v3064_v18 }
 0x488   :  { %v3636_v31 = vsel %vm3627_vm7, %v3586_v3, %v3635_v24  ;;  %v3199_v58 = vadd.f32 %v3198_v45, %v3197_v28  ;;  %v3203_v46 = vadd.f32 %v3202_v36, %v3201_v33  ;;  %v3218_v0 = vrot.slane %v3065_v11, 4 }
 0x489   :  { %v3637_v14 = vsel %vm3629_vm8, %v3587_v25, %v3636_v31  ;;  %v3588_v44 = vunpack.c.l.b16 %v3806_v23  ;;  %v3209_v4 = vadd.f32 %v3208_v56, %v3207_v29  ;;  %v3214_v5 = vrot.slane %v3213_v1, 2 }
 0x48a   :  { %v3667_v30 = vpack.c.b16 %v3637_v14, %v3637_v14  ;;  %v3807_v42 = vpack.c.bf16 %v3199_v58, %v3199_v58  ;;  %v3204_v26 = vrot.slane %v3203_v46, 1  ;;  %v3219_v48 = vadd.f32 %v3218_v0, %v3065_v11  ;;  %v2937_v17 = vpop.permute.xlu1 %2936  ;;  %v2942_v19 = vpop.permute.xlu0 %2941 }
 0x48b   :  { %v3210_v39 = vrot.slane %v3209_v4, 1  ;;  %v3215_v53 = vadd.f32 %v3214_v5, %v3213_v1  ;;  %v3066_v6 = vmul.f32 %v2917_v12, %v5533_v10  ;;  %v3067_v52 = vmul.f32 %v2922_v37, %v5533_v10 }
 0x48c   :  { %3679 = vst [vmem:[#allocation14 + $0x4] sm:$0xf] %v3667_v30  ;;  %v3589_v61 = vunpack.c.l.b16 %v3807_v42  ;;  %v3205_v2 = vadd.f32 %v3204_v26, %v3203_v46  ;;  %v3220_v40 = vrot.slane %v3219_v48, 2  ;;  %v3068_v34 = vmul.f32 %v2927_v20, %v5534_v8 }
 0x48d   :  { %v3211_v51 = vadd.f32 %v3210_v39, %v3209_v4  ;;  %v3216_v55 = vrot.slane %v3215_v53, 1  ;;  %v3224_v59 = vrot.slane %v3066_v6, 4  ;;  %v3230_v54 = vrot.slane %v3067_v52, 4  ;;  %v5535_v4 = vld [vmem:[#allocation27_spill] sm:$0xff] }
 0x48e   :  { %v3638_v21 = vsel %vm1540_vm1, %v3589_v61, %v3588_v44  ;;  %v3808_v32 = vpack.c.bf16 %v3205_v2, %v3205_v2  ;;  %v3221_v60 = vadd.f32 %v3220_v40, %v3219_v48  ;;  %v3236_v57 = vrot.slane %v3068_v34, 4  ;;  %v2947_v12 = vpop.permute.xlu1 %2946  ;;  %v2952_v37 = vpop.permute.xlu0 %2951 }
 0x48f   :  { %v3809_v15 = vpack.c.bf16 %v3211_v51, %v3211_v51  ;;  %v3217_v63 = vadd.f32 %v3216_v55, %v3215_v53  ;;  %v3225_v35 = vadd.f32 %v3224_v59, %v3066_v6  ;;  %v3231_v47 = vadd.f32 %v3230_v54, %v3067_v52 }
 0x490   :  { %v3590_v7 = vunpack.c.l.b16 %v3808_v32  ;;  %v3222_v50 = vrot.slane %v3221_v60, 1  ;;  %v3237_v43 = vadd.f32 %v3236_v57, %v3068_v34  ;;  %v3069_v16 = vmul.f32 %v2932_v41, %v5534_v8 }
 0x491   :  { %v3591_v62 = vunpack.c.l.b16 %v3809_v15  ;;  %v3810_v9 = vpack.c.bf16 %v3217_v63, %v3217_v63  ;;  %v3226_v13 = vrot.slane %v3225_v35, 2  ;;  %v3232_v10 = vrot.slane %v3231_v47, 2 }
 0x492   :  { %v3639_v18 = vsel %vm1542_vm2, %v3590_v7, %v3638_v21  ;;  %v3223_v24 = vadd.f32 %v3222_v50, %v3221_v60  ;;  %v3238_v49 = vrot.slane %v3237_v43, 2  ;;  %v3242_v28 = vrot.slane %v3069_v16, 4  ;;  %v2957_v58 = vpop.permute.xlu1 %2956  ;;  %v2962_v46 = vpop.permute.xlu0 %2961 }
 0x493   :  { %v3640_v33 = vsel %vm1544_vm3, %v3591_v62, %v3639_v18  ;;  %v3592_v22 = vunpack.c.l.b16 %v3810_v9  ;;  %v3227_v27 = vadd.f32 %v3226_v13, %v3225_v35  ;;  %v3233_v29 = vadd.f32 %v3232_v10, %v3231_v47 }
 0x494   :  { %v3811_v38 = vpack.c.bf16 %v3223_v24, %v3223_v24  ;;  %v3239_v3 = vadd.f32 %v3238_v49, %v3237_v43  ;;  %v3243_v45 = vadd.f32 %v3242_v28, %v3069_v16  ;;  %v3070_v36 = vmul.f32 %v2937_v17, %v5534_v8 }
 0x495   :  { %v3641_v11 = vsel %vm3623_vm5, %v3592_v22, %v3640_v33  ;;  %v3228_v20 = vrot.slane %v3227_v27, 1  ;;  %v3234_v41 = vrot.slane %v3233_v29, 1  ;;  %v3071_v25 = vmul.f32 %v2942_v19, %v5534_v8  ;;  %v5536_v33 = vld [vmem:[#allocation28_spill] sm:$0xff] }
 0x496   :  { %v3593_v23 = vunpack.c.l.b16 %v3811_v38  ;;  %v3240_v56 = vrot.slane %v3239_v3, 1  ;;  %v3244_v1 = vrot.slane %v3243_v45, 2  ;;  %v3248_v31 = vrot.slane %v3070_v36, 4  ;;  %v2967_v32 = vpop.permute.xlu1 %2966  ;;  %v2972_v60 = vpop.permute.xlu0 %2971 }
 0x497   :  { %v3229_v0 = vadd.f32 %v3228_v20, %v3227_v27  ;;  %v3235_v14 = vadd.f32 %v3234_v41, %v3233_v29  ;;  %v3254_v44 = vrot.slane %v3071_v25, 4  ;;  %v3072_v5 = vmul.f32 %v2947_v12, %v5535_v4 }
 0x498   :  { %v3642_v30 = vsel %vm3625_vm6, %v3593_v23, %v3641_v11  ;;  %v3241_v42 = vadd.f32 %v3240_v56, %v3239_v3  ;;  %v3245_v26 = vadd.f32 %v3244_v1, %v3243_v45  ;;  %v3249_v48 = vadd.f32 %v3248_v31, %v3070_v36 }
 0x499   :  { %v3812_v17 = vpack.c.bf16 %v3229_v0, %v3229_v0  ;;  %v3813_v39 = vpack.c.bf16 %v3235_v14, %v3235_v14  ;;  %v3255_v53 = vadd.f32 %v3254_v44, %v3071_v25  ;;  %v3260_v19 = vrot.slane %v3072_v5, 4 }
 0x49a   :  { %v3814_v6 = vpack.c.bf16 %v3241_v42, %v3241_v42  ;;  %v3246_v52 = vrot.slane %v3245_v26, 1  ;;  %v3250_v61 = vrot.slane %v3249_v48, 2  ;;  %v3073_v2 = vmul.f32 %v2952_v37, %v5535_v4  ;;  %v2982_v45 = vpop.permute.xlu1 %2981  ;;  %v2977_v36 = vpop.permute.xlu0 %2976 }
 0x49b   :  { %v3594_v40 = vunpack.c.l.b16 %v3812_v17  ;;  %v3595_v8 = vunpack.c.l.b16 %v3813_v39  ;;  %v3256_v34 = vrot.slane %v3255_v53, 2  ;;  %v3261_v51 = vadd.f32 %v3260_v19, %v3072_v5 }
 0x49c   :  { %v3596_v55 = vunpack.c.l.b16 %v3814_v6  ;;  %v3247_v59 = vadd.f32 %v3246_v52, %v3245_v26  ;;  %v3251_v54 = vadd.f32 %v3250_v61, %v3249_v48  ;;  %v3266_v21 = vrot.slane %v3073_v2, 4 }
 0x49d   :  { %v3643_v57 = vsel %vm3627_vm7, %v3594_v40, %v3642_v30  ;;  %v3257_v15 = vadd.f32 %v3256_v34, %v3255_v53  ;;  %v3262_v63 = vrot.slane %v3261_v51, 2  ;;  %v3074_v35 = vmul.f32 %v2957_v58, %v5535_v4 }
 0x49e   :  { %v3644_v47 = vsel %vm3629_vm8, %v3595_v8, %v3643_v57  ;;  %v3815_v7 = vpack.c.bf16 %v3247_v59, %v3247_v59  ;;  %v3252_v50 = vrot.slane %v3251_v54, 1  ;;  %v3267_v43 = vadd.f32 %v3266_v21, %v3073_v2  ;;  %v5537_v57 = vld [vmem:[#allocation30_spill] sm:$0xff] }
 0x49f   :  { %v3668_v16 = vpack.c.b16 %v3644_v47, %v3644_v47  ;;  %v3258_v12 = vrot.slane %v3257_v15, 1  ;;  %v3263_v37 = vadd.f32 %v3262_v63, %v3261_v51  ;;  %v3272_v62 = vrot.slane %v3074_v35, 4 }
 0x4a0   :  { %v3597_v9 = vunpack.c.l.b16 %v3815_v7  ;;  %v3253_v13 = vadd.f32 %v3252_v50, %v3251_v54  ;;  %v3268_v10 = vrot.slane %v3267_v43, 2  ;;  %v3075_v18 = vmul.f32 %v2962_v46, %v5535_v4 }
 0x4a1   :  { %3680 = vst [vmem:[#allocation14 + $0x8] sm:$0xf] %v3668_v16  ;;  %v3259_v24 = vadd.f32 %v3258_v12, %v3257_v15  ;;  %v3264_v49 = vrot.slane %v3263_v37, 1  ;;  %v3273_v28 = vadd.f32 %v3272_v62, %v3074_v35  ;;  %v3076_v22 = vmul.f32 %v2967_v32, %v5536_v33 }
 0x4a2   :  { %v3645_v27 = vsel %vm1540_vm1, %v3597_v9, %v3596_v55  ;;  %v3816_v29 = vpack.c.bf16 %v3253_v13, %v3253_v13  ;;  %v3269_v38 = vadd.f32 %v3268_v10, %v3267_v43  ;;  %v3278_v3 = vrot.slane %v3075_v18, 4 }
 0x4a3   :  { %v3817_v11 = vpack.c.bf16 %v3259_v24, %v3259_v24  ;;  %v3265_v20 = vadd.f32 %v3264_v49, %v3263_v37  ;;  %v3274_v41 = vrot.slane %v3273_v28, 2  ;;  %v3284_v25 = vrot.slane %v3076_v22, 4 }
 0x4a4   :  { %v3598_v23 = vunpack.c.l.b16 %v3816_v29  ;;  %v3270_v56 = vrot.slane %v3269_v38, 1  ;;  %v3279_v1 = vadd.f32 %v3278_v3, %v3075_v18  ;;  %v3077_v31 = vmul.f32 %v2972_v60, %v5536_v33 }
 0x4a5   :  { %v3599_v58 = vunpack.c.l.b16 %v3817_v11  ;;  %v3818_v46 = vpack.c.bf16 %v3265_v20, %v3265_v20  ;;  %v3275_v0 = vadd.f32 %v3274_v41, %v3273_v28  ;;  %v3285_v14 = vadd.f32 %v3284_v25, %v3076_v22 }
 0x4a6   :  { %v3646_v44 = vsel %vm1542_vm2, %v3598_v23, %v3645_v27  ;;  %v3271_v4 = vadd.f32 %v3270_v56, %v3269_v38  ;;  %v3280_v5 = vrot.slane %v3279_v1, 2  ;;  %v3290_v30 = vrot.slane %v3077_v31, 4  ;;  %v3007_v42 = vpop.permute.xlu1 %3006  ;;  %v3012_v26 = vpop.permute.xlu0 %3011 }
 0x4a7   :  { %v3647_v48 = vsel %vm1544_vm3, %v3599_v58, %v3646_v44  ;;  %v3600_v17 = vunpack.c.l.b16 %v3818_v46  ;;  %v3276_v39 = vrot.slane %v3275_v0, 1  ;;  %v3286_v53 = vrot.slane %v3285_v14, 2 }
 0x4a8   :  { %v3819_v19 = vpack.c.bf16 %v3271_v4, %v3271_v4  ;;  %v3281_v6 = vadd.f32 %v3280_v5, %v3279_v1  ;;  %v3291_v52 = vadd.f32 %v3290_v30, %v3077_v31  ;;  %v3079_v61 = vmul.f32 %v2982_v45, %v5536_v33  ;;  %v5538_v31 = vld [vmem:[#allocation29_spill] sm:$0xff] }
 0x4a9   :  { %v3648_v2 = vsel %vm3623_vm5, %v3600_v17, %v3647_v48  ;;  %v3277_v40 = vadd.f32 %v3276_v39, %v3275_v0  ;;  %v3287_v8 = vadd.f32 %v3286_v53, %v3285_v14  ;;  %v3078_v34 = vmul.f32 %v2977_v36, %v5536_v33 }
 0x4aa   :  { %v3601_v51 = vunpack.c.l.b16 %v3819_v19  ;;  %v3282_v55 = vrot.slane %v3281_v6, 1  ;;  %v3292_v59 = vrot.slane %v3291_v52, 2  ;;  %v3302_v54 = vrot.slane %v3079_v61, 4  ;;  %v3017_v21 = vpop.permute.xlu1 %3016  ;;  %v3022_v7 = vpop.permute.xlu0 %3021 }
 0x4ab   :  { %v3820_v32 = vpack.c.bf16 %v3277_v40, %v3277_v40  ;;  %v3296_v60 = vrot.slane %v3078_v34, 4  ;;  %v3084_v15 = vmul.f32 %v3007_v42, %v5537_v57  ;;  %v3288_v35 = vrot.slane %v3287_v8, 1 }
 0x4ac   :  { %v3283_v63 = vadd.f32 %v3282_v55, %v3281_v6  ;;  %v3293_v47 = vadd.f32 %v3292_v59, %v3291_v52  ;;  %v3649_v50 = vsel %vm3625_vm6, %v3601_v51, %v3648_v2  ;;  %v3303_v16 = vadd.f32 %v3302_v54, %v3079_v61  ;;  %v5539_v2 = vld [vmem:[#allocation31_spill] sm:$0xff] }
 0x4ad   :  { %v3602_v43 = vunpack.c.l.b16 %v3820_v32  ;;  %v3297_v12 = vadd.f32 %v3296_v60, %v3078_v34  ;;  %v3332_v9 = vrot.slane %v3084_v15, 4  ;;  %v3085_v13 = vmul.f32 %v3012_v26, %v5537_v57 }
 0x4ae   :  { %v3821_v37 = vpack.c.bf16 %v3283_v63, %v3283_v63  ;;  %v3294_v62 = vrot.slane %v3293_v47, 1  ;;  %v2992_v18 = vpop.permute.xlu1 %2991  ;;  %v3289_v49 = vadd.f32 %v3288_v35, %v3287_v8  ;;  %v3304_v33 = vrot.slane %v3303_v16, 2  ;;  %v2987_v45 = vpop.permute.xlu0 %2986 }
 0x4af   :  { %v3650_v10 = vsel %vm3627_vm7, %v3602_v43, %v3649_v50  ;;  %v3338_v28 = vrot.slane %v3085_v13, 4  ;;  %v3298_v22 = vrot.slane %v3297_v12, 2  ;;  %v3086_v27 = vmul.f32 %v3017_v21, %v5537_v57 }
 0x4b0   :  { %v3603_v24 = vunpack.c.l.b16 %v3821_v37  ;;  %v3295_v38 = vadd.f32 %v3294_v62, %v3293_v47  ;;  %v3333_v3 = vadd.f32 %v3332_v9, %v3084_v15  ;;  %v3822_v41 = vpack.c.bf16 %v3289_v49, %v3289_v49 }
 0x4b1   :  { %v3339_v11 = vadd.f32 %v3338_v28, %v3085_v13  ;;  %v3344_v20 = vrot.slane %v3086_v27, 4  ;;  %v3087_v25 = vmul.f32 %v3022_v7, %v5537_v57  ;;  %v3305_v23 = vadd.f32 %v3304_v33, %v3303_v16 }
 0x4b2   :  { %v3651_v29 = vsel %vm3629_vm8, %v3603_v24, %v3650_v10  ;;  %v3299_v56 = vadd.f32 %v3298_v22, %v3297_v12  ;;  %v3081_v58 = vmul.f32 %v2992_v18, %v5538_v31  ;;  %v3027_v46 = vpop.permute.xlu1 %3026  ;;  %v3823_v0 = vpack.c.bf16 %v3295_v38, %v3295_v38  ;;  %v2997_v48 = vpop.permute.xlu0 %2996 }
 0x4b3   :  { %v3669_v36 = vpack.c.b16 %v3651_v29, %v3651_v29  ;;  %v3345_v1 = vadd.f32 %v3344_v20, %v3086_v27  ;;  %v3334_v14 = vrot.slane %v3333_v3, 2  ;;  %v3350_v44 = vrot.slane %v3087_v25, 4 }
 0x4b4   :  { %v3340_v4 = vrot.slane %v3339_v11, 2  ;;  %v3314_v30 = vrot.slane %v3081_v58, 4  ;;  %v3080_v26 = vmul.f32 %v2987_v45, %v5538_v31  ;;  %v3604_v17 = vunpack.c.l.b16 %v3822_v41 }
 0x4b5   :  { %3681 = vst [vmem:[#allocation14 + $0xc] sm:$0xf] %v3669_v36  ;;  %v3346_v5 = vrot.slane %v3345_v1, 2  ;;  %v3351_v42 = vadd.f32 %v3350_v44, %v3087_v25  ;;  %v3306_v39 = vrot.slane %v3305_v23, 1  ;;  %v3300_v53 = vrot.slane %v3299_v56, 1 }
 0x4b6   :  { %v3315_v19 = vadd.f32 %v3314_v30, %v3081_v58  ;;  %v3605_v6 = vunpack.c.l.b16 %v3823_v0  ;;  %v3335_v52 = vadd.f32 %v3334_v14, %v3333_v3  ;;  %v3308_v61 = vrot.slane %v3080_v26, 4  ;;  %v3037_v51 = vpop.permute.xlu1 %3036  ;;  %v3032_v7 = vpop.permute.xlu0 %3031 }
 0x4b7   :  { %v3088_v40 = vmul.f32 %v3027_v46, %v5539_v2  ;;  %v3341_v8 = vadd.f32 %v3340_v4, %v3339_v11  ;;  %v3347_v34 = vadd.f32 %v3346_v5, %v3345_v1  ;;  %v3352_v55 = vrot.slane %v3351_v42, 2 }
 0x4b8   :  { %v3316_v59 = vrot.slane %v3315_v19, 2  ;;  %v3309_v54 = vadd.f32 %v3308_v61, %v3080_v26  ;;  %v3307_v21 = vadd.f32 %v3306_v39, %v3305_v23  ;;  %v3301_v32 = vadd.f32 %v3300_v53, %v3299_v56 }
 0x4b9   :  { %v3356_v60 = vrot.slane %v3088_v40, 4  ;;  %v3082_v57 = vmul.f32 %v2997_v48, %v5538_v31  ;;  %v3652_v15 = vsel %vm1540_vm1, %v3605_v6, %v3604_v17  ;;  %v3336_v63 = vrot.slane %v3335_v52, 1 }
 0x4ba   :  { %v3310_v35 = vrot.slane %v3309_v54, 2  ;;  %v3090_v47 = vmul.f32 %v3037_v51, %v5539_v2  ;;  %v3342_v50 = vrot.slane %v3341_v8, 1  ;;  %v3348_v43 = vrot.slane %v3347_v34, 1  ;;  %v3002_v29 = vpop.permute.xlu1 %3001  ;;  %v3042_v23 = vpop.permute.xlu0 %3041 }
 0x4bb   :  { %v3357_v16 = vadd.f32 %v3356_v60, %v3088_v40  ;;  %v3320_v12 = vrot.slane %v3082_v57, 4  ;;  %v3353_v37 = vadd.f32 %v3352_v55, %v3351_v42  ;;  %v3317_v62 = vadd.f32 %v3316_v59, %v3315_v19 }
 0x4bc   :  { %v3311_v9 = vadd.f32 %v3310_v35, %v3309_v54  ;;  %v3368_v13 = vrot.slane %v3090_v47, 4  ;;  %v3825_v10 = vpack.c.bf16 %v3307_v21, %v3307_v21  ;;  %v3824_v18 = vpack.c.bf16 %v3301_v32, %v3301_v32 }
 0x4bd   :  { %v3358_v24 = vrot.slane %v3357_v16, 2  ;;  %v3321_v49 = vadd.f32 %v3320_v12, %v3082_v57  ;;  %v3337_v28 = vadd.f32 %v3336_v63, %v3335_v52  ;;  %v3089_v27 = vmul.f32 %v3032_v7, %v5539_v2 }
 0x4be   :  { %v3312_v33 = vrot.slane %v3311_v9, 1  ;;  %v3369_v22 = vadd.f32 %v3368_v13, %v3090_v47  ;;  %v3343_v38 = vadd.f32 %v3342_v50, %v3341_v8  ;;  %v3349_v3 = vadd.f32 %v3348_v43, %v3347_v34 }
 0x4bf   :  { %v3359_v45 = vadd.f32 %v3358_v24, %v3357_v16  ;;  %v3322_v36 = vrot.slane %v3321_v49, 2  ;;  %v3354_v11 = vrot.slane %v3353_v37, 1  ;;  %v3318_v20 = vrot.slane %v3317_v62, 1 }
 0x4c0   :  { %v3370_v41 = vrot.slane %v3369_v22, 2  ;;  %v3362_v25 = vrot.slane %v3089_v27, 4  ;;  %v3606_v56 = vunpack.c.l.b16 %v3824_v18  ;;  %v3083_v46 = vmul.f32 %v3002_v29, %v5538_v31 }
 0x4c1   :  { %v3360_v1 = vrot.slane %v3359_v45, 1  ;;  %v3323_v58 = vadd.f32 %v3322_v36, %v3321_v49  ;;  %v3830_v0 = vpack.c.bf16 %v3337_v28, %v3337_v28  ;;  %v3313_v14 = vadd.f32 %v3312_v33, %v3311_v9 }
 0x4c2   :  { %v3371_v44 = vadd.f32 %v3370_v41, %v3369_v22  ;;  %v3363_v4 = vadd.f32 %v3362_v25, %v3089_v27  ;;  %v3831_v5 = vpack.c.bf16 %v3343_v38, %v3343_v38  ;;  %v3326_v42 = vrot.slane %v3083_v46, 4 }
 0x4c3   :  { %v3324_v30 = vrot.slane %v3323_v58, 1  ;;  %v3091_v26 = vmul.f32 %v3042_v23, %v5539_v2  ;;  %v3832_v48 = vpack.c.bf16 %v3349_v3, %v3349_v3  ;;  %v3355_v17 = vadd.f32 %v3354_v11, %v3353_v37 }
 0x4c4   :  { %v3319_v39 = vadd.f32 %v3318_v20, %v3317_v62  ;;  %v3364_v53 = vrot.slane %v3363_v4, 2  ;;  %v3361_v19 = vadd.f32 %v3360_v1, %v3359_v45  ;;  %v3372_v6 = vrot.slane %v3371_v44, 1 }
 0x4c5   :  { %v3327_v52 = vadd.f32 %v3326_v42, %v3083_v46  ;;  %v3374_v61 = vrot.slane %v3091_v26, 4  ;;  %v3607_v40 = vunpack.c.l.b16 %v3825_v10  ;;  %v3826_v8 = vpack.c.bf16 %v3313_v14, %v3313_v14 }
 0x4c6   :  { %v3325_v31 = vadd.f32 %v3324_v30, %v3323_v58  ;;  %v3365_v34 = vadd.f32 %v3364_v53, %v3363_v4  ;;  %v3653_v51 = vsel %vm1542_vm2, %v3606_v56, %v3652_v15  ;;  %v3612_v55 = vunpack.c.l.b16 %v3830_v0 }
 0x4c7   :  { %v3613_v59 = vunpack.c.l.b16 %v3831_v5  ;;  %v3328_v54 = vrot.slane %v3327_v52, 2  ;;  %v3614_v21 = vunpack.c.l.b16 %v3832_v48  ;;  %v3833_v32 = vpack.c.bf16 %v3355_v17, %v3355_v17 }
 0x4c8   :  { %v3366_v2 = vrot.slane %v3365_v34, 1  ;;  %v3375_v60 = vadd.f32 %v3374_v61, %v3091_v26  ;;  %v3827_v57 = vpack.c.bf16 %v3319_v39, %v3319_v39  ;;  %v3834_v63 = vpack.c.bf16 %v3361_v19, %v3361_v19 }
 0x4c9   :  { %v3373_v35 = vadd.f32 %v3372_v6, %v3371_v44  ;;  %v3329_v47 = vadd.f32 %v3328_v54, %v3327_v52  ;;  %v3608_v7 = vunpack.c.l.b16 %v3826_v8  ;;  %v3828_v50 = vpack.c.bf16 %v3325_v31, %v3325_v31 }
 0x4ca   :  { %v3367_v43 = vadd.f32 %v3366_v2, %v3365_v34  ;;  %v3376_v16 = vrot.slane %v3375_v60, 2  ;;  %v3659_v12 = vsel %vm1540_vm1, %v3613_v59, %v3612_v55  ;;  %v3654_v37 = vsel %vm1544_vm3, %v3607_v40, %v3653_v51 }
 0x4cb   :  { %v3330_v15 = vrot.slane %v3329_v47, 1  ;;  %v3660_v62 = vsel %vm1542_vm2, %v3614_v21, %v3659_v12  ;;  %v3615_v9 = vunpack.c.l.b16 %v3833_v32  ;;  %v3609_v18 = vunpack.c.l.b16 %v3827_v57 }
 0x4cc   :  { %v3835_v13 = vpack.c.bf16 %v3367_v43, %v3367_v43  ;;  %v3377_v10 = vadd.f32 %v3376_v16, %v3375_v60  ;;  %v3616_v24 = vunpack.c.l.b16 %v3834_v63  ;;  %v3836_v49 = vpack.c.bf16 %v3373_v35, %v3373_v35 }
 0x4cd   :  { %v3331_v28 = vadd.f32 %v3330_v15, %v3329_v47  ;;  %v3655_v33 = vsel %vm3623_vm5, %v3608_v7, %v3654_v37  ;;  %v3610_v22 = vunpack.c.l.b16 %v3828_v50  ;;  %v3661_v3 = vsel %vm1544_vm3, %v3615_v9, %v3660_v62 }
 0x4ce   :  { %v3617_v27 = vunpack.c.l.b16 %v3835_v13  ;;  %v3378_v29 = vrot.slane %v3377_v10, 1  ;;  %v3662_v36 = vsel %vm3623_vm5, %v3616_v24, %v3661_v3  ;;  %v3656_v11 = vsel %vm3625_vm6, %v3609_v18, %v3655_v33 }
 0x4cf   :  { %v3829_v38 = vpack.c.bf16 %v3331_v28, %v3331_v28  ;;  %v3618_v20 = vunpack.c.l.b16 %v3836_v49  ;;  %v3657_v25 = vsel %vm3627_vm7, %v3610_v22, %v3656_v11 }
 0x4d0   :  { %v3379_v45 = vadd.f32 %v3378_v29, %v3377_v10  ;;  %v3663_v23 = vsel %vm3625_vm6, %v3617_v27, %v3662_v36 }
 0x4d1   :  { %v3611_v41 = vunpack.c.l.b16 %v3829_v38  ;;  %v3664_v0 = vsel %vm3627_vm7, %v3618_v20, %v3663_v23 }
 0x4d2   :  { %v3837_v56 = vpack.c.bf16 %v3379_v45, %v3379_v45 }
 0x4d3   :  { %v3658_v1 = vsel %vm3629_vm8, %v3611_v41, %v3657_v25 }
 0x4d4   :  { %v3670_v58 = vpack.c.b16 %v3658_v1, %v3658_v1  ;;  %v3619_v46 = vunpack.c.l.b16 %v3837_v56 }
 0x4d6   :  { %3682 = vst [vmem:[#allocation14 + $0x10] sm:$0xf] %v3670_v58  ;;  %v3665_v14 = vsel %vm3629_vm8, %v3619_v46, %v3664_v0 }
 0x4d7   :  { %v3671_v44 = vpack.c.b16 %v3665_v14, %v3665_v14 }
 0x4d9   :  { %3683 = vst [vmem:[#allocation14 + $0x14] sm:$0xf] %v3671_v44 }
 0x4da   :  { %4234 = shalt.err (!%p4231_p10)
}
 0x4db   :  { %s4235_s23 = scalar_lea.hbm %s5454_s6, 384 }
 0x4dc   :  { %p4236_p11 = scmp.ne.s32.totalorder %s5454_s6, %s4235_s23  ;;  %p4239_p12 = scmp.lt.u32.totalorder %s4235_s23, %s5454_s6 }
 0x4de   :  { %p4241_p13 = pnand %p4239_p12, %p4236_p11 }
 0x4e0   :  { %4244 = shalt.err (!%p4241_p13)
}
 0x4e1   :  { %3695 = dma.vmem_to_hbm [thread:$0]  %s3690_s1, 384, %s5454_s6, [#allocation5], %s4256_s7, %s4256_s7, %s4257_s8  }
 0x4e2   :  { %4253 = dma.done.wait [#allocation5], 384  }
 0x4e3   :  { %4254 = vsyncadd [#allocation5], 4294966912 }
 0x4e4   :  { %3699 = vsyncpa [#allocation4], 1 }
 0x4e5   :  { %3700 = vsyncpa [#allocation7], 1 }
 0x4e6   :  { %3701 = vsyncpa [#allocation10], 1 }
 0x4e7   :  { %3702 = vsyncpa [#allocation13], 1 }
 0x4e8   :  { %3703 = vsyncpa [#allocation5], 1 }

</bundles_post_ra>
